<compile_context>
chip_gen: v7x
topology: tpu7x:2x2x1
jax: 0.10.0
libtpu: 0.0.40
codegen_flags: <defaults>
</compile_context>

<pallas_src>
import math
import functools

import jax
import jax.numpy as jnp
from jax.experimental import pallas as pl
from jax.experimental.pallas import tpu as pltpu

SQRT_2_OVER_PI = math.sqrt(2.0 / math.pi)
BN_EPS = 1e-5
_ROW_TILE = 256  # row tile for the simple row-wise kernels


def _gelu(x):
    # QAGNN repo GELU (tanh approximation), computed in f32 on the VPU/EUP.
    return 0.5 * x * (1.0 + jnp.tanh(SQRT_2_OVER_PI * (x + 0.044715 * x * x * x)))


def _vmem():
    return pl.BlockSpec(memory_space=pltpu.MemorySpace.VMEM)


# ------------------------- row-tiled pallas_call helper -------------------------

def _row_call(kernel, row_args, bcast_args, out_cols, out_dtype):
    """Row-wise kernels: tile over rows ('parallel' grid axis for megacore/v7x),
    pin weights/biases whole-array to every grid step."""
    rows = row_args[0].shape[0]
    tile = rows if rows <= _ROW_TILE else _ROW_TILE
    grid = (pl.cdiv(rows, tile),)
    in_specs = ([pl.BlockSpec((tile, a.shape[1]), lambda i: (i, 0)) for a in row_args]
                + [pl.BlockSpec(a.shape, lambda i: (0, 0)) for a in bcast_args])
    return pl.pallas_call(
        kernel,
        grid=grid,
        in_specs=in_specs,
        out_specs=pl.BlockSpec((tile, out_cols), lambda i: (i, 0)),
        out_shape=jax.ShapeDtypeStruct((rows, out_cols), out_dtype),
        compiler_params=pltpu.CompilerParams(dimension_semantics=("parallel",)),
    )(*row_args, *bcast_args)


# ----------------------------- simple row-wise kernels -----------------------------

def _node_features_kernel(t_ref, score_ref, js_ref, wnt_ref, bnt_ref, wsc_ref, bsc_ref,
                          o_ref):
    # node_feature_extra = [GELU(emb_node_type(T)), GELU(emb_score(sin basis))]
    # written lane-dense via zero-padded (left/right half) weights, so a single
    # unmasked store and no in-kernel concatenation.
    f32 = jnp.float32
    a = jnp.dot(t_ref[...], wnt_ref[...], preferred_element_type=f32) + bnt_ref[...]
    basis = jnp.sin(score_ref[...] * js_ref[...])            # sin(1.1**j * node_score)
    b = jnp.dot(basis.astype(jnp.bfloat16), wsc_ref[...],
                preferred_element_type=f32) + bsc_ref[...]
    o_ref[...] = (_gelu(a) + _gelu(b)).astype(o_ref.dtype)


def node_features(t_onehot, score, js, wnt_pad, bnt_pad, wsc_pad, bsc_pad):
    return _row_call(_node_features_kernel, [t_onehot, score],
                     [js, wnt_pad, bnt_pad, wsc_pad, bsc_pad],
                     wnt_pad.shape[1], jnp.bfloat16)


def _mlp2_kernel(x_ref, w1_ref, b1_ref, w2_ref, b2_ref, o_ref):
    # Linear -> (BN folded into W1/b1) -> ReLU -> Linear
    f32 = jnp.float32
    h = jnp.maximum(
        jnp.dot(x_ref[...], w1_ref[...], preferred_element_type=f32) + b1_ref[...], 0.0)
    y = jnp.dot(h.astype(jnp.bfloat16), w2_ref[...], preferred_element_type=f32) + b2_ref[...]
    o_ref[...] = y.astype(o_ref.dtype)


def mlp2(x, w1, b1, w2, b2):
    return _row_call(_mlp2_kernel, [x],
                     [w1, b1.reshape(1, -1), w2, b2.reshape(1, -1)],
                     w2.shape[1], jnp.bfloat16)


def _vh_vx_kernel(h_ref, x_ref, wh_ref, bh_ref, wx_ref, bx_ref, o_ref):
    f32 = jnp.float32
    y = (jnp.dot(h_ref[...], wh_ref[...], preferred_element_type=f32) + bh_ref[...]
         + jnp.dot(x_ref[...], wx_ref[...], preferred_element_type=f32) + bx_ref[...])
    o_ref[...] = _gelu(y).astype(o_ref.dtype)


def vh_vx_gelu(h, x, wh, bh, wx, bx):
    return _row_call(_vh_vx_kernel, [h, x],
                     [wh, bh.reshape(1, -1), wx, bx.reshape(1, -1)],
                     wh.shape[1], jnp.float32)


# ----------------------------- fused per-layer GAT kernel -----------------------------

def _gat_layer_kernel(scale,
                      x_ref, nfe_ref, ee_ref, src_ref, tgt_ref, ecnt_ref,
                      wkx1_ref, wkx2_ref, wke_ref, bk_ref,
                      wmx1_ref, wmx2_ref, wme_ref, bm_ref,
                      wqx1_ref, wqx2_ref, bq_ref,
                      pool_ref, expand_ref,
                      w1_ref, b1_ref, w2_ref, b2_ref,
                      o_ref):
    f32 = jnp.float32
    bf = jnp.bfloat16

    def nn_dot(a, b):      # plain matmul, f32 accumulation on the MXU
        return jax.lax.dot_general(a, b, (((1,), (0,)), ((), ())),
                                   preferred_element_type=f32)

    def tn_dot(a, b):      # a^T @ b without materializing the transpose
        return jax.lax.dot_general(a, b, (((0,), (0,)), ((), ())),
                                   preferred_element_type=f32)

    x = x_ref[...]         # (N, D)  bf16 node states
    nfe = nfe_ref[...]     # (N, D)  bf16 node_feature_extra
    ee = ee_ref[...]       # (E, D)  bf16 edge embeddings
    src = src_ref[...]     # (E, N)  bf16 one-hot of the source node of each edge
    tgt = tgt_ref[...]     # (E, N)  bf16 one-hot of the target node of each edge

    # Key/msg/query projections in node space (cheaper than per-edge; E >= N).
    proj_k = nn_dot(x, wkx1_ref[...]) + nn_dot(nfe, wkx2_ref[...])                  # (N, D)
    proj_m = nn_dot(x, wmx1_ref[...]) + nn_dot(nfe, wmx2_ref[...])                  # (N, D)
    proj_q = nn_dot(x, wqx1_ref[...]) + nn_dot(nfe, wqx2_ref[...]) + bq_ref[...]    # (N, D)

    # Gather node rows into edge space via one-hot matmuls (MXU), add edge parts.
    key = nn_dot(tgt, proj_k.astype(bf)) + nn_dot(ee, wke_ref[...]) + bk_ref[...]   # x_i = x[tgt]
    msg = nn_dot(src, proj_m.astype(bf)) + nn_dot(ee, wme_ref[...]) + bm_ref[...]   # x_j = x[src]
    query = nn_dot(src, proj_q.astype(bf)) * scale

    # Per-head attention logits: block-diagonal head pooling as one MXU matmul.
    scores = nn_dot((query * key).astype(bf), pool_ref[...])                         # (E, H)

    # Segment softmax over edges grouped by source node.  A global per-head max is
    # shift-equivalent to PyG's per-group max; the denominator is eps-clamped so a
    # fully-underflowed group cannot produce 0/0.
    # TODO(synk): exact per-source-group max subtraction.
    smax = jnp.max(scores, axis=0, keepdims=True)
    ex = jnp.exp(scores - smax)
    gsum = tn_dot(src, ex.astype(bf))                                                # (N, H)
    denom = nn_dot(src, gsum.astype(bf))                                             # (E, H)
    alpha = ex / jnp.maximum(denom, 1e-12)
    alpha = alpha * ecnt_ref[...]                    # scale by #edges sharing the source node

    # Broadcast per-head attention across dim_per_head, weight messages,
    # scatter-add over target nodes (aggr='add').
    alpha_full = nn_dot(alpha.astype(bf), expand_ref[...])                           # (E, D)
    weighted = (msg * alpha_full).astype(bf)
    aggr = tn_dot(tgt, weighted)                                                     # (N, D)

    # Layer MLP (Linear -> folded BN -> ReLU -> Linear) fused with post-layer GELU;
    # F.dropout is identity in eval mode.
    h = jnp.maximum(nn_dot(aggr.astype(bf), w1_ref[...]) + b1_ref[...], 0.0)
    y = nn_dot(h.astype(bf), w2_ref[...]) + b2_ref[...]
    o_ref[...] = _gelu(y).astype(o_ref.dtype)


def gat_layer(x, nfe, edge_emb, onehot_src, onehot_tgt, ecount,
              lp, mlp_w1, mlp_b1, pool, expand, scale):
    # TODO(synk): not row-tiled across TensorCores (global segment-softmax /
    # scatter dependency); fine at QAGNN graph sizes, revisit for v7x multi-TC.
    n, d = x.shape
    bf = jnp.bfloat16
    return pl.pallas_call(
        functools.partial(_gat_layer_kernel, scale),
        in_specs=[_vmem()] * 23,
        out_specs=_vmem(),
        out_shape=jax.ShapeDtypeStruct((n, d), bf),
        compiler_params=pltpu.CompilerParams(vmem_limit_bytes=48 * 1024 * 1024),
    )(x, nfe, edge_emb, onehot_src, onehot_tgt, ecount,
      lp["wk_x1"].astype(bf), lp["wk_x2"].astype(bf), lp["wk_e"].astype(bf),
      lp["bk"].reshape(1, d),
      lp["wm_x1"].astype(bf), lp["wm_x2"].astype(bf), lp["wm_e"].astype(bf),
      lp["bm"].reshape(1, d),
      lp["wq_x1"].astype(bf), lp["wq_x2"].astype(bf),
      lp["bq"].reshape(1, d),
      pool, expand,
      mlp_w1.astype(bf), mlp_b1.reshape(1, d),
      lp["mlp"]["w2"].astype(bf), lp["mlp"]["b2"].reshape(1, d))


# ----------------------------- parameters -----------------------------

def _linear_init(key, fan_in, fan_out):
    kw, kb = jax.random.split(key)
    bound = 1.0 / math.sqrt(fan_in)
    w = jax.random.uniform(kw, (fan_in, fan_out), jnp.float32, -bound, bound)
    b = jax.random.uniform(kb, (fan_out,), jnp.float32, -bound, bound)
    return w, b


def _bn_init(d):
    return {"gamma": jnp.ones((d,), jnp.float32), "beta": jnp.zeros((d,), jnp.float32),
            "mean": jnp.zeros((d,), jnp.float32), "var": jnp.ones((d,), jnp.float32)}


def _fold_bn(w, b, bn):
    # eval-mode BatchNorm1d folded into the preceding Linear (pure affine).
    scale = bn["gamma"] * jax.lax.rsqrt(bn["var"] + BN_EPS)
    shift = bn["beta"] - bn["mean"] * scale
    return w * scale[None, :], b * scale + shift


def init_params(key, hidden, n_ntype, n_etype, k):
    D = hidden
    keys = iter(jax.random.split(key, 6 + 5 * k))
    p = {}
    p["emb_nt_w"], p["emb_nt_b"] = _linear_init(next(keys), n_ntype, D // 2)
    p["emb_sc_w"], p["emb_sc_b"] = _linear_init(next(keys), D // 2, D // 2)
    ee_in = n_etype + 1 + n_ntype * 2
    w1, b1 = _linear_init(next(keys), ee_in, D)
    w2, b2 = _linear_init(next(keys), D, D)
    p["edge_enc"] = {"w1": w1, "b1": b1, "w2": w2, "b2": b2, **_bn_init(D)}
    p["vh_w"], p["vh_b"] = _linear_init(next(keys), D, D)
    p["vx_w"], p["vx_b"] = _linear_init(next(keys), D, D)
    layers = []
    for _ in range(k):
        wk, bk = _linear_init(next(keys), 3 * D, D)
        wm, bm = _linear_init(next(keys), 3 * D, D)
        wq, bq = _linear_init(next(keys), 2 * D, D)
        mw1, mb1 = _linear_init(next(keys), D, D)
        mw2, mb2 = _linear_init(next(keys), D, D)
        layers.append({
            # linear_key / linear_msg take cat([X, node_feature_extra, edge_attr]);
            # linear_query takes cat([X, node_feature_extra]).  Weights pre-split
            # so the kernel never concatenates.
            "wk_x1": wk[:D], "wk_x2": wk[D:2 * D], "wk_e": wk[2 * D:], "bk": bk,
            "wm_x1": wm[:D], "wm_x2": wm[D:2 * D], "wm_e": wm[2 * D:], "bm": bm,
            "wq_x1": wq[:D], "wq_x2": wq[D:], "bq": bq,
            "mlp": {"w1": mw1, "b1": mb1, "w2": mw2, "b2": mb2, **_bn_init(D)},
        })
    p["layers"] = layers
    return p


# ----------------------------- forward -----------------------------

def make_forward(hidden, n_ntype, n_etype, k, head_count):
    D = hidden
    half = D // 2
    dim_per_head = D // head_count
    scale = 1.0 / math.sqrt(dim_per_head)
    bf = jnp.bfloat16
    # block-diagonal (D, H) head-pooling matrix; expand = its transpose.
    pool = (jnp.arange(D)[:, None] // dim_per_head
            == jnp.arange(head_count)[None, :]).astype(bf)
    expand = pool.T
    js = jnp.power(1.1, jnp.arange(half, dtype=jnp.float32)).reshape(1, half)

    def forward(params, H, edge_index, edge_type, node_type, node_score):
        bsz, n_node, d = H.shape
        n_tot = bsz * n_node
        nt_flat = node_type.reshape(-1)
        f32 = jnp.float32

        # ---- node_feature_extra (layer-invariant), one fused kernel ----
        t_onehot = jax.nn.one_hot(nt_flat, n_ntype, dtype=bf)
        wnt_pad = jnp.concatenate(
            [params["emb_nt_w"], jnp.zeros((n_ntype, half), f32)], axis=1).astype(bf)
        bnt_pad = jnp.concatenate(
            [params["emb_nt_b"], jnp.zeros((half,), f32)]).reshape(1, D)
        wsc_pad = jnp.concatenate(
            [jnp.zeros((half, half), f32), params["emb_sc_w"]], axis=1).astype(bf)
        bsc_pad = jnp.concatenate(
            [jnp.zeros((half,), f32), params["emb_sc_b"]]).reshape(1, D)
        nfe = node_features(t_onehot, node_score.reshape(n_tot, 1), js,
                            wnt_pad, bnt_pad, wsc_pad, bsc_pad)          # (N, D) bf16

        # ---- edge embeddings (shared encoder, layer-invariant) ----
        edge_vec = jax.nn.one_hot(edge_type, n_etype + 1, dtype=bf)
        self_edge_vec = jnp.zeros((n_tot, n_etype + 1), bf).at[:, n_etype].set(1.0)
        head_vec = jax.nn.one_hot(nt_flat[edge_index[0]], n_ntype, dtype=bf)
        tail_vec = jax.nn.one_hot(nt_flat[edge_index[1]], n_ntype, dtype=bf)
        self_head_vec = jax.nn.one_hot(nt_flat, n_ntype, dtype=bf)
        edge_enc_in = jnp.concatenate(
            [jnp.concatenate([edge_vec, self_edge_vec], axis=0),
             jnp.concatenate([jnp.concatenate([head_vec, tail_vec], axis=1),
                              jnp.concatenate([self_head_vec, self_head_vec], axis=1)],
                             axis=0)], axis=1)
        ep = params["edge_enc"]
        ew1, eb1 = _fold_bn(ep["w1"], ep["b1"], ep)
        edge_emb = mlp2(edge_enc_in, ew1.astype(bf), eb1,
                        ep["w2"].astype(bf), ep["b2"])                   # (E_tot, D) bf16

        # ---- graph structure (layer-invariant) ----
        loop = jnp.arange(n_tot, dtype=edge_index.dtype)
        ei = jnp.concatenate([edge_index, jnp.stack([loop, loop])], axis=1)
        src, tgt = ei[0], ei[1]
        onehot_src = jax.nn.one_hot(src, n_tot, dtype=bf)                # (E_tot, N)
        onehot_tgt = jax.nn.one_hot(tgt, n_tot, dtype=bf)                # (E_tot, N)
        counts = jnp.sum(onehot_src.astype(f32), axis=0)                 # src-node degree
        ecount = counts[src].reshape(-1, 1)                              # (E_tot, 1)

        # ---- k GAT layers: one fused pallas_call each ----
        h_flat_bf = H.reshape(n_tot, d).astype(bf)
        _X = h_flat_bf
        for lp in params["layers"]:
            mw1, mb1 = _fold_bn(lp["mlp"]["w1"], lp["mlp"]["b1"], lp["mlp"])
            _X = gat_layer(_X, nfe, edge_emb, onehot_src, onehot_tgt, ecount,
                           lp, mw1, mb1, pool, expand, scale)

        # ---- output head: GELU(Vh(H) + Vx(X)); dropout is identity in eval ----
        out = vh_vx_gelu(h_flat_bf, _X,
                         params["vh_w"].astype(bf), params["vh_b"],
                         params["vx_w"].astype(bf), params["vx_b"])
        return out.reshape(bsz, n_node, d)

    return forward


# ----------------------------- main -----------------------------

if __name__ == "__main__":
    hidden = 32
    n_ntype = 4
    n_etype = 5
    k = 2
    head_count = 4
    bsz, n_node = 2, 8
    n_tot = bsz * n_node
    n_edges = 20

    key = jax.random.PRNGKey(0)
    kp, kh, ks, knt, kei, ket = jax.random.split(key, 6)
    params = init_params(kp, hidden, n_ntype, n_etype, k)
    H = jax.random.normal(kh, (bsz, n_node, hidden), jnp.float32)
    node_score = jax.random.normal(ks, (bsz, n_node, 1), jnp.float32)
    node_type = jax.random.randint(knt, (bsz, n_node), 0, n_ntype)
    edge_index = jax.random.randint(kei, (2, n_edges), 0, n_tot)
    edge_type = jax.random.randint(ket, (n_edges,), 0, n_etype)

    forward = jax.jit(make_forward(hidden, n_ntype, n_etype, k, head_count))
    out = forward(params, H, edge_index, edge_type, node_type, node_score)
    out = jax.block_until_ready(out)
    assert out.shape == (bsz, n_node, hidden)
    assert bool(jnp.all(jnp.isfinite(out)))
    print("KERNEL_OK")
</pallas_src>

<mosaic_0001>
module attributes {stable_mosaic.version = 11 : i64} {
  func.func @_mlp2_kernel(%arg0: i32, %arg1: memref<36x14xbf16, #tpu.memory_space<vmem>>, %arg2: memref<14x32xbf16, #tpu.memory_space<vmem>>, %arg3: memref<1x32xf32, #tpu.memory_space<vmem>>, %arg4: memref<32x32xbf16, #tpu.memory_space<vmem>>, %arg5: memref<1x32xf32, #tpu.memory_space<vmem>>, %arg6: memref<36x32xbf16, #tpu.memory_space<vmem>>) attributes {dimension_semantics = [#tpu.dimension_semantics<parallel>], iteration_bounds = array<i64: 1>, scalar_prefetch = 0 : i64, scratch_operands = 0 : i64, tpu.core_type = #tpu.core_type<tc>, window_params = [{transform_indices = @transform_0, window_bounds = array<i64: 36, 14>}, {pipeline_mode = #tpu.pipeline_mode<synchronous>, transform_indices = @transform_1, window_bounds = array<i64: 14, 32>}, {pipeline_mode = #tpu.pipeline_mode<synchronous>, transform_indices = @transform_2, window_bounds = array<i64: 1, 32>}, {pipeline_mode = #tpu.pipeline_mode<synchronous>, transform_indices = @transform_3, window_bounds = array<i64: 32, 32>}, {pipeline_mode = #tpu.pipeline_mode<synchronous>, transform_indices = @transform_4, window_bounds = array<i64: 1, 32>}, {transform_indices = @transform_5, window_bounds = array<i64: 36, 32>}]} {
    %c0 = arith.constant 0 : index
    %c0_0 = arith.constant 0 : index
    %0 = vector.load %arg1[%c0, %c0_0] : memref<36x14xbf16, #tpu.memory_space<vmem>>, vector<36x14xbf16>
    %c0_1 = arith.constant 0 : index
    %c0_2 = arith.constant 0 : index
    %1 = vector.load %arg2[%c0_1, %c0_2] : memref<14x32xbf16, #tpu.memory_space<vmem>>, vector<14x32xbf16>
    %cst = arith.constant dense<0.000000e+00> : vector<36x32xf32>
    %2 = tpu.matmul %0, %1, %cst {dimension_numbers = #tpu.dot_dimension_numbers<[1], [0], [0], [1], [0, 0, 1, 1], [], []>} : vector<36x14xbf16>, vector<14x32xbf16>, vector<36x32xf32> -> vector<36x32xf32>
    %c0_3 = arith.constant 0 : index
    %c0_4 = arith.constant 0 : index
    %3 = vector.load %arg3[%c0_3, %c0_4] : memref<1x32xf32, #tpu.memory_space<vmem>>, vector<1x32xf32>
    %4 = vector.broadcast %3 : vector<1x32xf32> to vector<36x32xf32>
    %5 = arith.addf %2, %4 : vector<36x32xf32>
    %cst_5 = arith.constant 0.000000e+00 : f32
    %6 = vector.broadcast %cst_5 : f32 to vector<36x32xf32>
    %7 = arith.maximumf %5, %6 : vector<36x32xf32>
    %8 = arith.truncf %7 : vector<36x32xf32> to vector<36x32xbf16>
    %c0_6 = arith.constant 0 : index
    %c0_7 = arith.constant 0 : index
    %9 = vector.load %arg4[%c0_6, %c0_7] : memref<32x32xbf16, #tpu.memory_space<vmem>>, vector<32x32xbf16>
    %cst_8 = arith.constant dense<0.000000e+00> : vector<36x32xf32>
    %10 = tpu.matmul %8, %9, %cst_8 {dimension_numbers = #tpu.dot_dimension_numbers<[1], [0], [0], [1], [0, 0, 1, 1], [], []>} : vector<36x32xbf16>, vector<32x32xbf16>, vector<36x32xf32> -> vector<36x32xf32>
    %c0_9 = arith.constant 0 : index
    %c0_10 = arith.constant 0 : index
    %11 = vector.load %arg5[%c0_9, %c0_10] : memref<1x32xf32, #tpu.memory_space<vmem>>, vector<1x32xf32>
    %12 = vector.broadcast %11 : vector<1x32xf32> to vector<36x32xf32>
    %13 = arith.addf %10, %12 : vector<36x32xf32>
    %14 = arith.truncf %13 : vector<36x32xf32> to vector<36x32xbf16>
    %c0_11 = arith.constant 0 : index
    %c0_12 = arith.constant 0 : index
    %15 = vector.load %arg6[%c0_11, %c0_12] : memref<36x32xbf16, #tpu.memory_space<vmem>>, vector<36x32xbf16>
    tpu.vector_store %arg6[%c0_11, %c0_12], %14 {strides = array<i32>} : memref<36x32xbf16, #tpu.memory_space<vmem>>, vector<36x32xbf16>,
    return
  }
  func.func @transform_0(%arg0: i32) -> (i32, i32) {
    %c0_i32 = arith.constant 0 : i32
    %c0_i32_0 = arith.constant 0 : i32
    return %arg0, %c0_i32 : i32, i32
  }
  func.func @transform_1(%arg0: i32) -> (i32, i32) {
    %c0_i32 = arith.constant 0 : i32
    %c0_i32_0 = arith.constant 0 : i32
    %c0_i32_1 = arith.constant 0 : i32
    return %c0_i32, %c0_i32_0 : i32, i32
  }
  func.func @transform_2(%arg0: i32) -> (i32, i32) {
    %c0_i32 = arith.constant 0 : i32
    %c0_i32_0 = arith.constant 0 : i32
    %c0_i32_1 = arith.constant 0 : i32
    return %c0_i32, %c0_i32_0 : i32, i32
  }
  func.func @transform_3(%arg0: i32) -> (i32, i32) {
    %c0_i32 = arith.constant 0 : i32
    %c0_i32_0 = arith.constant 0 : i32
    %c0_i32_1 = arith.constant 0 : i32
    return %c0_i32, %c0_i32_0 : i32, i32
  }
  func.func @transform_4(%arg0: i32) -> (i32, i32) {
    %c0_i32 = arith.constant 0 : i32
    %c0_i32_0 = arith.constant 0 : i32
    %c0_i32_1 = arith.constant 0 : i32
    return %c0_i32, %c0_i32_0 : i32, i32
  }
  func.func @transform_5(%arg0: i32) -> (i32, i32) {
    %c0_i32 = arith.constant 0 : i32
    %c0_i32_0 = arith.constant 0 : i32
    return %arg0, %c0_i32 : i32, i32
  }
}

module attributes {stable_mosaic.version = 11 : i64} {
  func.func @_node_features_kernel(%arg0: i32, %arg1: memref<16x4xbf16, #tpu.memory_space<vmem>>, %arg2: memref<16x1xf32, #tpu.memory_space<vmem>>, %arg3: memref<1x16xf32, #tpu.memory_space<vmem>>, %arg4: memref<4x32xbf16, #tpu.memory_space<vmem>>, %arg5: memref<1x32xf32, #tpu.memory_space<vmem>>, %arg6: memref<16x32xbf16, #tpu.memory_space<vmem>>, %arg7: memref<1x32xf32, #tpu.memory_space<vmem>>, %arg8: memref<16x32xbf16, #tpu.memory_space<vmem>>) attributes {dimension_semantics = [#tpu.dimension_semantics<parallel>], iteration_bounds = array<i64: 1>, scalar_prefetch = 0 : i64, scratch_operands = 0 : i64, tpu.core_type = #tpu.core_type<tc>, window_params = [{transform_indices = @transform_0, window_bounds = array<i64: 16, 4>}, {transform_indices = @transform_1, window_bounds = array<i64: 16, 1>}, {pipeline_mode = #tpu.pipeline_mode<synchronous>, transform_indices = @transform_2, window_bounds = array<i64: 1, 16>}, {pipeline_mode = #tpu.pipeline_mode<synchronous>, transform_indices = @transform_3, window_bounds = array<i64: 4, 32>}, {pipeline_mode = #tpu.pipeline_mode<synchronous>, transform_indices = @transform_4, window_bounds = array<i64: 1, 32>}, {pipeline_mode = #tpu.pipeline_mode<synchronous>, transform_indices = @transform_5, window_bounds = array<i64: 16, 32>}, {pipeline_mode = #tpu.pipeline_mode<synchronous>, transform_indices = @transform_6, window_bounds = array<i64: 1, 32>}, {transform_indices = @transform_7, window_bounds = array<i64: 16, 32>}]} {
    %c0 = arith.constant 0 : index
    %c0_0 = arith.constant 0 : index
    %0 = vector.load %arg1[%c0, %c0_0] : memref<16x4xbf16, #tpu.memory_space<vmem>>, vector<16x4xbf16>
    %c0_1 = arith.constant 0 : index
    %c0_2 = arith.constant 0 : index
    %1 = vector.load %arg4[%c0_1, %c0_2] : memref<4x32xbf16, #tpu.memory_space<vmem>>, vector<4x32xbf16>
    %cst = arith.constant dense<0.000000e+00> : vector<16x32xf32>
    %2 = tpu.matmul %0, %1, %cst {dimension_numbers = #tpu.dot_dimension_numbers<[1], [0], [0], [1], [0, 0, 1, 1], [], []>} : vector<16x4xbf16>, vector<4x32xbf16>, vector<16x32xf32> -> vector<16x32xf32>
    %c0_3 = arith.constant 0 : index
    %c0_4 = arith.constant 0 : index
    %3 = vector.load %arg5[%c0_3, %c0_4] : memref<1x32xf32, #tpu.memory_space<vmem>>, vector<1x32xf32>
    %4 = vector.broadcast %3 : vector<1x32xf32> to vector<16x32xf32>
    %5 = arith.addf %2, %4 : vector<16x32xf32>
    %c0_5 = arith.constant 0 : index
    %c0_6 = arith.constant 0 : index
    %6 = vector.load %arg2[%c0_5, %c0_6] : memref<16x1xf32, #tpu.memory_space<vmem>>, vector<16x1xf32>
    %c0_7 = arith.constant 0 : index
    %c0_8 = arith.constant 0 : index
    %7 = vector.load %arg3[%c0_7, %c0_8] : memref<1x16xf32, #tpu.memory_space<vmem>>, vector<1x16xf32>
    %8 = vector.broadcast %6 : vector<16x1xf32> to vector<16x16xf32>
    %9 = vector.broadcast %7 : vector<1x16xf32> to vector<16x16xf32>
    %10 = arith.mulf %8, %9 : vector<16x16xf32>
    %11 = math.sin %10 : vector<16x16xf32>
    %12 = arith.truncf %11 : vector<16x16xf32> to vector<16x16xbf16>
    %c0_9 = arith.constant 0 : index
    %c0_10 = arith.constant 0 : index
    %13 = vector.load %arg6[%c0_9, %c0_10] : memref<16x32xbf16, #tpu.memory_space<vmem>>, vector<16x32xbf16>
    %cst_11 = arith.constant dense<0.000000e+00> : vector<16x32xf32>
    %14 = tpu.matmul %12, %13, %cst_11 {dimension_numbers = #tpu.dot_dimension_numbers<[1], [0], [0], [1], [0, 0, 1, 1], [], []>} : vector<16x16xbf16>, vector<16x32xbf16>, vector<16x32xf32> -> vector<16x32xf32>
    %c0_12 = arith.constant 0 : index
    %c0_13 = arith.constant 0 : index
    %15 = vector.load %arg7[%c0_12, %c0_13] : memref<1x32xf32, #tpu.memory_space<vmem>>, vector<1x32xf32>
    %16 = vector.broadcast %15 : vector<1x32xf32> to vector<16x32xf32>
    %17 = arith.addf %14, %16 : vector<16x32xf32>
    %cst_14 = arith.constant 5.000000e-01 : f32
    %18 = vector.broadcast %cst_14 : f32 to vector<16x32xf32>
    %19 = arith.mulf %18, %5 : vector<16x32xf32>
    %cst_15 = arith.constant 4.471500e-02 : f32
    %20 = vector.broadcast %cst_15 : f32 to vector<16x32xf32>
    %21 = arith.mulf %20, %5 : vector<16x32xf32>
    %22 = arith.mulf %21, %5 : vector<16x32xf32>
    %23 = arith.mulf %22, %5 : vector<16x32xf32>
    %24 = arith.addf %5, %23 : vector<16x32xf32>
    %cst_16 = arith.constant 0.797884583 : f32
    %25 = vector.broadcast %cst_16 : f32 to vector<16x32xf32>
    %26 = arith.mulf %25, %24 : vector<16x32xf32>
    %27 = math.tanh %26 : vector<16x32xf32>
    %cst_17 = arith.constant 1.000000e+00 : f32
    %28 = vector.broadcast %cst_17 : f32 to vector<16x32xf32>
    %29 = arith.addf %28, %27 : vector<16x32xf32>
    %30 = arith.mulf %19, %29 : vector<16x32xf32>
    %cst_18 = arith.constant 5.000000e-01 : f32
    %31 = vector.broadcast %cst_18 : f32 to vector<16x32xf32>
    %32 = arith.mulf %31, %17 : vector<16x32xf32>
    %cst_19 = arith.constant 4.471500e-02 : f32
    %33 = vector.broadcast %cst_19 : f32 to vector<16x32xf32>
    %34 = arith.mulf %33, %17 : vector<16x32xf32>
    %35 = arith.mulf %34, %17 : vector<16x32xf32>
    %36 = arith.mulf %35, %17 : vector<16x32xf32>
    %37 = arith.addf %17, %36 : vector<16x32xf32>
    %cst_20 = arith.constant 0.797884583 : f32
    %38 = vector.broadcast %cst_20 : f32 to vector<16x32xf32>
    %39 = arith.mulf %38, %37 : vector<16x32xf32>
    %40 = math.tanh %39 : vector<16x32xf32>
    %cst_21 = arith.constant 1.000000e+00 : f32
    %41 = vector.broadcast %cst_21 : f32 to vector<16x32xf32>
    %42 = arith.addf %41, %40 : vector<16x32xf32>
    %43 = arith.mulf %32, %42 : vector<16x32xf32>
    %44 = arith.addf %30, %43 : vector<16x32xf32>
    %45 = arith.truncf %44 : vector<16x32xf32> to vector<16x32xbf16>
    %c0_22 = arith.constant 0 : index
    %c0_23 = arith.constant 0 : index
    %46 = vector.load %arg8[%c0_22, %c0_23] : memref<16x32xbf16, #tpu.memory_space<vmem>>, vector<16x32xbf16>
    tpu.vector_store %arg8[%c0_22, %c0_23], %45 {strides = array<i32>} : memref<16x32xbf16, #tpu.memory_space<vmem>>, vector<16x32xbf16>,
    return
  }
  func.func @transform_0(%arg0: i32) -> (i32, i32) {
    %c0_i32 = arith.constant 0 : i32
    %c0_i32_0 = arith.constant 0 : i32
    return %arg0, %c0_i32 : i32, i32
  }
  func.func @transform_1(%arg0: i32) -> (i32, i32) {
    %c0_i32 = arith.constant 0 : i32
    %c0_i32_0 = arith.constant 0 : i32
    return %arg0, %c0_i32 : i32, i32
  }
  func.func @transform_2(%arg0: i32) -> (i32, i32) {
    %c0_i32 = arith.constant 0 : i32
    %c0_i32_0 = arith.constant 0 : i32
    %c0_i32_1 = arith.constant 0 : i32
    return %c0_i32, %c0_i32_0 : i32, i32
  }
  func.func @transform_3(%arg0: i32) -> (i32, i32) {
    %c0_i32 = arith.constant 0 : i32
    %c0_i32_0 = arith.constant 0 : i32
    %c0_i32_1 = arith.constant 0 : i32
    return %c0_i32, %c0_i32_0 : i32, i32
  }
  func.func @transform_4(%arg0: i32) -> (i32, i32) {
    %c0_i32 = arith.constant 0 : i32
    %c0_i32_0 = arith.constant 0 : i32
    %c0_i32_1 = arith.constant 0 : i32
    return %c0_i32, %c0_i32_0 : i32, i32
  }
  func.func @transform_5(%arg0: i32) -> (i32, i32) {
    %c0_i32 = arith.constant 0 : i32
    %c0_i32_0 = arith.constant 0 : i32
    %c0_i32_1 = arith.constant 0 : i32
    return %c0_i32, %c0_i32_0 : i32, i32
  }
  func.func @transform_6(%arg0: i32) -> (i32, i32) {
    %c0_i32 = arith.constant 0 : i32
    %c0_i32_0 = arith.constant 0 : i32
    %c0_i32_1 = arith.constant 0 : i32
    return %c0_i32, %c0_i32_0 : i32, i32
  }
  func.func @transform_7(%arg0: i32) -> (i32, i32) {
    %c0_i32 = arith.constant 0 : i32
    %c0_i32_0 = arith.constant 0 : i32
    return %arg0, %c0_i32 : i32, i32
  }
}

module attributes {stable_mosaic.version = 11 : i64} {
  func.func @_gat_layer_kernel(%arg0: memref<16x32xbf16, #tpu.memory_space<vmem>>, %arg1: memref<16x32xbf16, #tpu.memory_space<vmem>>, %arg2: memref<36x32xbf16, #tpu.memory_space<vmem>>, %arg3: memref<36x16xbf16, #tpu.memory_space<vmem>>, %arg4: memref<36x16xbf16, #tpu.memory_space<vmem>>, %arg5: memref<36x1xf32, #tpu.memory_space<vmem>>, %arg6: memref<32x32xbf16, #tpu.memory_space<vmem>>, %arg7: memref<32x32xbf16, #tpu.memory_space<vmem>>, %arg8: memref<32x32xbf16, #tpu.memory_space<vmem>>, %arg9: memref<1x32xf32, #tpu.memory_space<vmem>>, %arg10: memref<32x32xbf16, #tpu.memory_space<vmem>>, %arg11: memref<32x32xbf16, #tpu.memory_space<vmem>>, %arg12: memref<32x32xbf16, #tpu.memory_space<vmem>>, %arg13: memref<1x32xf32, #tpu.memory_space<vmem>>, %arg14: memref<32x32xbf16, #tpu.memory_space<vmem>>, %arg15: memref<32x32xbf16, #tpu.memory_space<vmem>>, %arg16: memref<1x32xf32, #tpu.memory_space<vmem>>, %arg17: memref<32x4xbf16, #tpu.memory_space<vmem>>, %arg18: memref<4x32xbf16, #tpu.memory_space<vmem>>, %arg19: memref<32x32xbf16, #tpu.memory_space<vmem>>, %arg20: memref<1x32xf32, #tpu.memory_space<vmem>>, %arg21: memref<32x32xbf16, #tpu.memory_space<vmem>>, %arg22: memref<1x32xf32, #tpu.memory_space<vmem>>, %arg23: memref<16x32xbf16, #tpu.memory_space<vmem>>) attributes {dimension_semantics = [], scalar_prefetch = 0 : i64, scratch_operands = 0 : i64, tpu.core_type = #tpu.core_type<tc>} {
    %c0 = arith.constant 0 : index
    %c0_0 = arith.constant 0 : index
    %0 = vector.load %arg0[%c0, %c0_0] : memref<16x32xbf16, #tpu.memory_space<vmem>>, vector<16x32xbf16>
    %c0_1 = arith.constant 0 : index
    %c0_2 = arith.constant 0 : index
    %1 = vector.load %arg1[%c0_1, %c0_2] : memref<16x32xbf16, #tpu.memory_space<vmem>>, vector<16x32xbf16>
    %c0_3 = arith.constant 0 : index
    %c0_4 = arith.constant 0 : index
    %2 = vector.load %arg2[%c0_3, %c0_4] : memref<36x32xbf16, #tpu.memory_space<vmem>>, vector<36x32xbf16>
    %c0_5 = arith.constant 0 : index
    %c0_6 = arith.constant 0 : index
    %3 = vector.load %arg3[%c0_5, %c0_6] : memref<36x16xbf16, #tpu.memory_space<vmem>>, vector<36x16xbf16>
    %c0_7 = arith.constant 0 : index
    %c0_8 = arith.constant 0 : index
    %4 = vector.load %arg4[%c0_7, %c0_8] : memref<36x16xbf16, #tpu.memory_space<vmem>>, vector<36x16xbf16>
    %c0_9 = arith.constant 0 : index
    %c0_10 = arith.constant 0 : index
    %5 = vector.load %arg6[%c0_9, %c0_10] : memref<32x32xbf16, #tpu.memory_space<vmem>>, vector<32x32xbf16>
    %cst = arith.constant dense<0.000000e+00> : vector<16x32xf32>
    %6 = tpu.matmul %0, %5, %cst {dimension_numbers = #tpu.dot_dimension_numbers<[1], [0], [0], [1], [0, 0, 1, 1], [], []>} : vector<16x32xbf16>, vector<32x32xbf16>, vector<16x32xf32> -> vector<16x32xf32>
    %c0_11 = arith.constant 0 : index
    %c0_12 = arith.constant 0 : index
    %7 = vector.load %arg7[%c0_11, %c0_12] : memref<32x32xbf16, #tpu.memory_space<vmem>>, vector<32x32xbf16>
    %cst_13 = arith.constant dense<0.000000e+00> : vector<16x32xf32>
    %8 = tpu.matmul %1, %7, %cst_13 {dimension_numbers = #tpu.dot_dimension_numbers<[1], [0], [0], [1], [0, 0, 1, 1], [], []>} : vector<16x32xbf16>, vector<32x32xbf16>, vector<16x32xf32> -> vector<16x32xf32>
    %9 = arith.addf %6, %8 : vector<16x32xf32>
    %c0_14 = arith.constant 0 : index
    %c0_15 = arith.constant 0 : index
    %10 = vector.load %arg10[%c0_14, %c0_15] : memref<32x32xbf16, #tpu.memory_space<vmem>>, vector<32x32xbf16>
    %cst_16 = arith.constant dense<0.000000e+00> : vector<16x32xf32>
    %11 = tpu.matmul %0, %10, %cst_16 {dimension_numbers = #tpu.dot_dimension_numbers<[1], [0], [0], [1], [0, 0, 1, 1], [], []>} : vector<16x32xbf16>, vector<32x32xbf16>, vector<16x32xf32> -> vector<16x32xf32>
    %c0_17 = arith.constant 0 : index
    %c0_18 = arith.constant 0 : index
    %12 = vector.load %arg11[%c0_17, %c0_18] : memref<32x32xbf16, #tpu.memory_space<vmem>>, vector<32x32xbf16>
    %cst_19 = arith.constant dense<0.000000e+00> : vector<16x32xf32>
    %13 = tpu.matmul %1, %12, %cst_19 {dimension_numbers = #tpu.dot_dimension_numbers<[1], [0], [0], [1], [0, 0, 1, 1], [], []>} : vector<16x32xbf16>, vector<32x32xbf16>, vector<16x32xf32> -> vector<16x32xf32>
    %14 = arith.addf %11, %13 : vector<16x32xf32>
    %c0_20 = arith.constant 0 : index
    %c0_21 = arith.constant 0 : index
    %15 = vector.load %arg14[%c0_20, %c0_21] : memref<32x32xbf16, #tpu.memory_space<vmem>>, vector<32x32xbf16>
    %cst_22 = arith.constant dense<0.000000e+00> : vector<16x32xf32>
    %16 = tpu.matmul %0, %15, %cst_22 {dimension_numbers = #tpu.dot_dimension_numbers<[1], [0], [0], [1], [0, 0, 1, 1], [], []>} : vector<16x32xbf16>, vector<32x32xbf16>, vector<16x32xf32> -> vector<16x32xf32>
    %c0_23 = arith.constant 0 : index
    %c0_24 = arith.constant 0 : index
    %17 = vector.load %arg15[%c0_23, %c0_24] : memref<32x32xbf16, #tpu.memory_space<vmem>>, vector<32x32xbf16>
    %cst_25 = arith.constant dense<0.000000e+00> : vector<16x32xf32>
    %18 = tpu.matmul %1, %17, %cst_25 {dimension_numbers = #tpu.dot_dimension_numbers<[1], [0], [0], [1], [0, 0, 1, 1], [], []>} : vector<16x32xbf16>, vector<32x32xbf16>, vector<16x32xf32> -> vector<16x32xf32>
    %19 = arith.addf %16, %18 : vector<16x32xf32>
    %c0_26 = arith.constant 0 : index
    %c0_27 = arith.constant 0 : index
    %20 = vector.load %arg16[%c0_26, %c0_27] : memref<1x32xf32, #tpu.memory_space<vmem>>, vector<1x32xf32>
    %21 = vector.broadcast %20 : vector<1x32xf32> to vector<16x32xf32>
    %22 = arith.addf %19, %21 : vector<16x32xf32>
    %23 = arith.truncf %9 : vector<16x32xf32> to vector<16x32xbf16>
    %cst_28 = arith.constant dense<0.000000e+00> : vector<36x32xf32>
    %24 = tpu.matmul %4, %23, %cst_28 {dimension_numbers = #tpu.dot_dimension_numbers<[1], [0], [0], [1], [0, 0, 1, 1], [], []>} : vector<36x16xbf16>, vector<16x32xbf16>, vector<36x32xf32> -> vector<36x32xf32>
    %c0_29 = arith.constant 0 : index
    %c0_30 = arith.constant 0 : index
    %25 = vector.load %arg8[%c0_29, %c0_30] : memref<32x32xbf16, #tpu.memory_space<vmem>>, vector<32x32xbf16>
    %cst_31 = arith.constant dense<0.000000e+00> : vector<36x32xf32>
    %26 = tpu.matmul %2, %25, %cst_31 {dimension_numbers = #tpu.dot_dimension_numbers<[1], [0], [0], [1], [0, 0, 1, 1], [], []>} : vector<36x32xbf16>, vector<32x32xbf16>, vector<36x32xf32> -> vector<36x32xf32>
    %27 = arith.addf %24, %26 : vector<36x32xf32>
    %c0_32 = arith.constant 0 : index
    %c0_33 = arith.constant 0 : index
    %28 = vector.load %arg9[%c0_32, %c0_33] : memref<1x32xf32, #tpu.memory_space<vmem>>, vector<1x32xf32>
    %29 = vector.broadcast %28 : vector<1x32xf32> to vector<36x32xf32>
    %30 = arith.addf %27, %29 : vector<36x32xf32>
    %31 = arith.truncf %14 : vector<16x32xf32> to vector<16x32xbf16>
    %cst_34 = arith.constant dense<0.000000e+00> : vector<36x32xf32>
    %32 = tpu.matmul %3, %31, %cst_34 {dimension_numbers = #tpu.dot_dimension_numbers<[1], [0], [0], [1], [0, 0, 1, 1], [], []>} : vector<36x16xbf16>, vector<16x32xbf16>, vector<36x32xf32> -> vector<36x32xf32>
    %c0_35 = arith.constant 0 : index
    %c0_36 = arith.constant 0 : index
    %33 = vector.load %arg12[%c0_35, %c0_36] : memref<32x32xbf16, #tpu.memory_space<vmem>>, vector<32x32xbf16>
    %cst_37 = arith.constant dense<0.000000e+00> : vector<36x32xf32>
    %34 = tpu.matmul %2, %33, %cst_37 {dimension_numbers = #tpu.dot_dimension_numbers<[1], [0], [0], [1], [0, 0, 1, 1], [], []>} : vector<36x32xbf16>, vector<32x32xbf16>, vector<36x32xf32> -> vector<36x32xf32>
    %35 = arith.addf %32, %34 : vector<36x32xf32>
    %c0_38 = arith.constant 0 : index
    %c0_39 = arith.constant 0 : index
    %36 = vector.load %arg13[%c0_38, %c0_39] : memref<1x32xf32, #tpu.memory_space<vmem>>, vector<1x32xf32>
    %37 = vector.broadcast %36 : vector<1x32xf32> to vector<36x32xf32>
    %38 = arith.addf %35, %37 : vector<36x32xf32>
    %39 = arith.truncf %22 : vector<16x32xf32> to vector<16x32xbf16>
    %cst_40 = arith.constant dense<0.000000e+00> : vector<36x32xf32>
    %40 = tpu.matmul %3, %39, %cst_40 {dimension_numbers = #tpu.dot_dimension_numbers<[1], [0], [0], [1], [0, 0, 1, 1], [], []>} : vector<36x16xbf16>, vector<16x32xbf16>, vector<36x32xf32> -> vector<36x32xf32>
    %cst_41 = arith.constant 0.353553385 : f32
    %41 = vector.broadcast %cst_41 : f32 to vector<36x32xf32>
    %42 = arith.mulf %40, %41 : vector<36x32xf32>
    %43 = arith.mulf %42, %30 : vector<36x32xf32>
    %44 = arith.truncf %43 : vector<36x32xf32> to vector<36x32xbf16>
    %c0_42 = arith.constant 0 : index
    %c0_43 = arith.constant 0 : index
    %45 = vector.load %arg17[%c0_42, %c0_43] : memref<32x4xbf16, #tpu.memory_space<vmem>>, vector<32x4xbf16>
    %cst_44 = arith.constant dense<0.000000e+00> : vector<36x4xf32>
    %46 = tpu.matmul %44, %45, %cst_44 {dimension_numbers = #tpu.dot_dimension_numbers<[1], [0], [0], [1], [0, 0, 1, 1], [], []>} : vector<36x32xbf16>, vector<32x4xbf16>, vector<36x4xf32> -> vector<36x4xf32>
    %cst_45 = arith.constant dense<0xFF800000> : vector<4xf32>
    %47 = vector.multi_reduction <maximumf>, %46, %cst_45 [0] : vector<36x4xf32> to vector<4xf32>
    %48 = vector.shape_cast %47 : vector<4xf32> to vector<1x4xf32>
    %49 = vector.broadcast %48 : vector<1x4xf32> to vector<36x4xf32>
    %50 = arith.subf %46, %49 : vector<36x4xf32>
    %51 = math.exp %50 : vector<36x4xf32>
    %52 = arith.truncf %51 : vector<36x4xf32> to vector<36x4xbf16>
    %cst_46 = arith.constant dense<0.000000e+00> : vector<16x4xf32>
    %53 = tpu.matmul %3, %52, %cst_46 {dimension_numbers = #tpu.dot_dimension_numbers<[0], [0], [1], [1], [0, 1, 1, 1], [], []>} : vector<36x16xbf16>, vector<36x4xbf16>, vector<16x4xf32> -> vector<16x4xf32>
    %54 = arith.truncf %53 : vector<16x4xf32> to vector<16x4xbf16>
    %cst_47 = arith.constant dense<0.000000e+00> : vector<36x4xf32>
    %55 = tpu.matmul %3, %54, %cst_47 {dimension_numbers = #tpu.dot_dimension_numbers<[1], [0], [0], [1], [0, 0, 1, 1], [], []>} : vector<36x16xbf16>, vector<16x4xbf16>, vector<36x4xf32> -> vector<36x4xf32>
    %cst_48 = arith.constant 9.99999996E-13 : f32
    %56 = vector.broadcast %cst_48 : f32 to vector<36x4xf32>
    %57 = arith.maximumf %55, %56 : vector<36x4xf32>
    %58 = arith.divf %51, %57 : vector<36x4xf32>
    %c0_49 = arith.constant 0 : index
    %c0_50 = arith.constant 0 : index
    %59 = vector.load %arg5[%c0_49, %c0_50] : memref<36x1xf32, #tpu.memory_space<vmem>>, vector<36x1xf32>
    %60 = vector.broadcast %59 : vector<36x1xf32> to vector<36x4xf32>
    %61 = arith.mulf %58, %60 : vector<36x4xf32>
    %62 = arith.truncf %61 : vector<36x4xf32> to vector<36x4xbf16>
    %c0_51 = arith.constant 0 : index
    %c0_52 = arith.constant 0 : index
    %63 = vector.load %arg18[%c0_51, %c0_52] : memref<4x32xbf16, #tpu.memory_space<vmem>>, vector<4x32xbf16>
    %cst_53 = arith.constant dense<0.000000e+00> : vector<36x32xf32>
    %64 = tpu.matmul %62, %63, %cst_53 {dimension_numbers = #tpu.dot_dimension_numbers<[1], [0], [0], [1], [0, 0, 1, 1], [], []>} : vector<36x4xbf16>, vector<4x32xbf16>, vector<36x32xf32> -> vector<36x32xf32>
    %65 = arith.mulf %38, %64 : vector<36x32xf32>
    %66 = arith.truncf %65 : vector<36x32xf32> to vector<36x32xbf16>
    %cst_54 = arith.constant dense<0.000000e+00> : vector<16x32xf32>
    %67 = tpu.matmul %4, %66, %cst_54 {dimension_numbers = #tpu.dot_dimension_numbers<[0], [0], [1], [1], [0, 1, 1, 1], [], []>} : vector<36x16xbf16>, vector<36x32xbf16>, vector<16x32xf32> -> vector<16x32xf32>
    %68 = arith.truncf %67 : vector<16x32xf32> to vector<16x32xbf16>
    %c0_55 = arith.constant 0 : index
    %c0_56 = arith.constant 0 : index
    %69 = vector.load %arg19[%c0_55, %c0_56] : memref<32x32xbf16, #tpu.memory_space<vmem>>, vector<32x32xbf16>
    %cst_57 = arith.constant dense<0.000000e+00> : vector<16x32xf32>
    %70 = tpu.matmul %68, %69, %cst_57 {dimension_numbers = #tpu.dot_dimension_numbers<[1], [0], [0], [1], [0, 0, 1, 1], [], []>} : vector<16x32xbf16>, vector<32x32xbf16>, vector<16x32xf32> -> vector<16x32xf32>
    %c0_58 = arith.constant 0 : index
    %c0_59 = arith.constant 0 : index
    %71 = vector.load %arg20[%c0_58, %c0_59] : memref<1x32xf32, #tpu.memory_space<vmem>>, vector<1x32xf32>
    %72 = vector.broadcast %71 : vector<1x32xf32> to vector<16x32xf32>
    %73 = arith.addf %70, %72 : vector<16x32xf32>
    %cst_60 = arith.constant 0.000000e+00 : f32
    %74 = vector.broadcast %cst_60 : f32 to vector<16x32xf32>
    %75 = arith.maximumf %73, %74 : vector<16x32xf32>
    %76 = arith.truncf %75 : vector<16x32xf32> to vector<16x32xbf16>
    %c0_61 = arith.constant 0 : index
    %c0_62 = arith.constant 0 : index
    %77 = vector.load %arg21[%c0_61, %c0_62] : memref<32x32xbf16, #tpu.memory_space<vmem>>, vector<32x32xbf16>
    %cst_63 = arith.constant dense<0.000000e+00> : vector<16x32xf32>
    %78 = tpu.matmul %76, %77, %cst_63 {dimension_numbers = #tpu.dot_dimension_numbers<[1], [0], [0], [1], [0, 0, 1, 1], [], []>} : vector<16x32xbf16>, vector<32x32xbf16>, vector<16x32xf32> -> vector<16x32xf32>
    %c0_64 = arith.constant 0 : index
    %c0_65 = arith.constant 0 : index
    %79 = vector.load %arg22[%c0_64, %c0_65] : memref<1x32xf32, #tpu.memory_space<vmem>>, vector<1x32xf32>
    %80 = vector.broadcast %79 : vector<1x32xf32> to vector<16x32xf32>
    %81 = arith.addf %78, %80 : vector<16x32xf32>
    %cst_66 = arith.constant 5.000000e-01 : f32
    %82 = vector.broadcast %cst_66 : f32 to vector<16x32xf32>
    %83 = arith.mulf %82, %81 : vector<16x32xf32>
    %cst_67 = arith.constant 4.471500e-02 : f32
    %84 = vector.broadcast %cst_67 : f32 to vector<16x32xf32>
    %85 = arith.mulf %84, %81 : vector<16x32xf32>
    %86 = arith.mulf %85, %81 : vector<16x32xf32>
    %87 = arith.mulf %86, %81 : vector<16x32xf32>
    %88 = arith.addf %81, %87 : vector<16x32xf32>
    %cst_68 = arith.constant 0.797884583 : f32
    %89 = vector.broadcast %cst_68 : f32 to vector<16x32xf32>
    %90 = arith.mulf %89, %88 : vector<16x32xf32>
    %91 = math.tanh %90 : vector<16x32xf32>
    %cst_69 = arith.constant 1.000000e+00 : f32
    %92 = vector.broadcast %cst_69 : f32 to vector<16x32xf32>
    %93 = arith.addf %92, %91 : vector<16x32xf32>
    %94 = arith.mulf %83, %93 : vector<16x32xf32>
    %95 = arith.truncf %94 : vector<16x32xf32> to vector<16x32xbf16>
    %c0_70 = arith.constant 0 : index
    %c0_71 = arith.constant 0 : index
    %96 = vector.load %arg23[%c0_70, %c0_71] : memref<16x32xbf16, #tpu.memory_space<vmem>>, vector<16x32xbf16>
    tpu.vector_store %arg23[%c0_70, %c0_71], %95 {strides = array<i32>} : memref<16x32xbf16, #tpu.memory_space<vmem>>, vector<16x32xbf16>,
    return
  }
}

module attributes {stable_mosaic.version = 11 : i64} {
  func.func @_vh_vx_kernel(%arg0: i32, %arg1: memref<16x32xbf16, #tpu.memory_space<vmem>>, %arg2: memref<16x32xbf16, #tpu.memory_space<vmem>>, %arg3: memref<32x32xbf16, #tpu.memory_space<vmem>>, %arg4: memref<1x32xf32, #tpu.memory_space<vmem>>, %arg5: memref<32x32xbf16, #tpu.memory_space<vmem>>, %arg6: memref<1x32xf32, #tpu.memory_space<vmem>>, %arg7: memref<16x32xf32, #tpu.memory_space<vmem>>) attributes {dimension_semantics = [#tpu.dimension_semantics<parallel>], iteration_bounds = array<i64: 1>, scalar_prefetch = 0 : i64, scratch_operands = 0 : i64, tpu.core_type = #tpu.core_type<tc>, window_params = [{transform_indices = @transform_0, window_bounds = array<i64: 16, 32>}, {transform_indices = @transform_1, window_bounds = array<i64: 16, 32>}, {pipeline_mode = #tpu.pipeline_mode<synchronous>, transform_indices = @transform_2, window_bounds = array<i64: 32, 32>}, {pipeline_mode = #tpu.pipeline_mode<synchronous>, transform_indices = @transform_3, window_bounds = array<i64: 1, 32>}, {pipeline_mode = #tpu.pipeline_mode<synchronous>, transform_indices = @transform_4, window_bounds = array<i64: 32, 32>}, {pipeline_mode = #tpu.pipeline_mode<synchronous>, transform_indices = @transform_5, window_bounds = array<i64: 1, 32>}, {transform_indices = @transform_6, window_bounds = array<i64: 16, 32>}]} {
    %c0 = arith.constant 0 : index
    %c0_0 = arith.constant 0 : index
    %0 = vector.load %arg1[%c0, %c0_0] : memref<16x32xbf16, #tpu.memory_space<vmem>>, vector<16x32xbf16>
    %c0_1 = arith.constant 0 : index
    %c0_2 = arith.constant 0 : index
    %1 = vector.load %arg3[%c0_1, %c0_2] : memref<32x32xbf16, #tpu.memory_space<vmem>>, vector<32x32xbf16>
    %cst = arith.constant dense<0.000000e+00> : vector<16x32xf32>
    %2 = tpu.matmul %0, %1, %cst {dimension_numbers = #tpu.dot_dimension_numbers<[1], [0], [0], [1], [0, 0, 1, 1], [], []>} : vector<16x32xbf16>, vector<32x32xbf16>, vector<16x32xf32> -> vector<16x32xf32>
    %c0_3 = arith.constant 0 : index
    %c0_4 = arith.constant 0 : index
    %3 = vector.load %arg4[%c0_3, %c0_4] : memref<1x32xf32, #tpu.memory_space<vmem>>, vector<1x32xf32>
    %4 = vector.broadcast %3 : vector<1x32xf32> to vector<16x32xf32>
    %5 = arith.addf %2, %4 : vector<16x32xf32>
    %c0_5 = arith.constant 0 : index
    %c0_6 = arith.constant 0 : index
    %6 = vector.load %arg2[%c0_5, %c0_6] : memref<16x32xbf16, #tpu.memory_space<vmem>>, vector<16x32xbf16>
    %c0_7 = arith.constant 0 : index
    %c0_8 = arith.constant 0 : index
    %7 = vector.load %arg5[%c0_7, %c0_8] : memref<32x32xbf16, #tpu.memory_space<vmem>>, vector<32x32xbf16>
    %cst_9 = arith.constant dense<0.000000e+00> : vector<16x32xf32>
    %8 = tpu.matmul %6, %7, %cst_9 {dimension_numbers = #tpu.dot_dimension_numbers<[1], [0], [0], [1], [0, 0, 1, 1], [], []>} : vector<16x32xbf16>, vector<32x32xbf16>, vector<16x32xf32> -> vector<16x32xf32>
    %9 = arith.addf %5, %8 : vector<16x32xf32>
    %c0_10 = arith.constant 0 : index
    %c0_11 = arith.constant 0 : index
    %10 = vector.load %arg6[%c0_10, %c0_11] : memref<1x32xf32, #tpu.memory_space<vmem>>, vector<1x32xf32>
    %11 = vector.broadcast %10 : vector<1x32xf32> to vector<16x32xf32>
    %12 = arith.addf %9, %11 : vector<16x32xf32>
    %cst_12 = arith.constant 5.000000e-01 : f32
    %13 = vector.broadcast %cst_12 : f32 to vector<16x32xf32>
    %14 = arith.mulf %13, %12 : vector<16x32xf32>
    %cst_13 = arith.constant 4.471500e-02 : f32
    %15 = vector.broadcast %cst_13 : f32 to vector<16x32xf32>
    %16 = arith.mulf %15, %12 : vector<16x32xf32>
    %17 = arith.mulf %16, %12 : vector<16x32xf32>
    %18 = arith.mulf %17, %12 : vector<16x32xf32>
    %19 = arith.addf %12, %18 : vector<16x32xf32>
    %cst_14 = arith.constant 0.797884583 : f32
    %20 = vector.broadcast %cst_14 : f32 to vector<16x32xf32>
    %21 = arith.mulf %20, %19 : vector<16x32xf32>
    %22 = math.tanh %21 : vector<16x32xf32>
    %cst_15 = arith.constant 1.000000e+00 : f32
    %23 = vector.broadcast %cst_15 : f32 to vector<16x32xf32>
    %24 = arith.addf %23, %22 : vector<16x32xf32>
    %25 = arith.mulf %14, %24 : vector<16x32xf32>
    %c0_16 = arith.constant 0 : index
    %c0_17 = arith.constant 0 : index
    %26 = vector.load %arg7[%c0_16, %c0_17] : memref<16x32xf32, #tpu.memory_space<vmem>>, vector<16x32xf32>
    tpu.vector_store %arg7[%c0_16, %c0_17], %25 {strides = array<i32>} : memref<16x32xf32, #tpu.memory_space<vmem>>, vector<16x32xf32>,
    return
  }
  func.func @transform_0(%arg0: i32) -> (i32, i32) {
    %c0_i32 = arith.constant 0 : i32
    %c0_i32_0 = arith.constant 0 : i32
    return %arg0, %c0_i32 : i32, i32
  }
  func.func @transform_1(%arg0: i32) -> (i32, i32) {
    %c0_i32 = arith.constant 0 : i32
    %c0_i32_0 = arith.constant 0 : i32
    return %arg0, %c0_i32 : i32, i32
  }
  func.func @transform_2(%arg0: i32) -> (i32, i32) {
    %c0_i32 = arith.constant 0 : i32
    %c0_i32_0 = arith.constant 0 : i32
    %c0_i32_1 = arith.constant 0 : i32
    return %c0_i32, %c0_i32_0 : i32, i32
  }
  func.func @transform_3(%arg0: i32) -> (i32, i32) {
    %c0_i32 = arith.constant 0 : i32
    %c0_i32_0 = arith.constant 0 : i32
    %c0_i32_1 = arith.constant 0 : i32
    return %c0_i32, %c0_i32_0 : i32, i32
  }
  func.func @transform_4(%arg0: i32) -> (i32, i32) {
    %c0_i32 = arith.constant 0 : i32
    %c0_i32_0 = arith.constant 0 : i32
    %c0_i32_1 = arith.constant 0 : i32
    return %c0_i32, %c0_i32_0 : i32, i32
  }
  func.func @transform_5(%arg0: i32) -> (i32, i32) {
    %c0_i32 = arith.constant 0 : i32
    %c0_i32_0 = arith.constant 0 : i32
    %c0_i32_1 = arith.constant 0 : i32
    return %c0_i32, %c0_i32_0 : i32, i32
  }
  func.func @transform_6(%arg0: i32) -> (i32, i32) {
    %c0_i32 = arith.constant 0 : i32
    %c0_i32_0 = arith.constant 0 : i32
    return %arg0, %c0_i32 : i32, i32
  }
}

</mosaic_0001>

<bundles_post_ra>
// kernel: eq.1
= control target key start
LH: loop header
LB: loop body
LE: loop exit
PB: predicated region body
PF: predicated region fallthrough
CT: control target
= control target key end

     0   :  { %vm7_vm0 = vcmask 64512   ;;  %vm13_vm1 = vcmask 130112   ;;  %s39_s0 = inlined_call_operand.vmem [shape: s32[2,8], index: 0, kind: input, shape index: {}]   ;;  %s40_s1 = inlined_call_operand.vmem [shape: s32[16], index: 1, kind: output, shape index: {}]  }
   0x1   :  { %v4_v0 = vld [vmem:[%s39_s0] sm:$0x3]  ;;  %s22_s0 = smov 8  }
   0x2   :  { %5 = vst [vmem:[#allocation1] sm:$0x3] %v4_v0 }
   0x9   :  { %v10_v1 = vld [vmem:[#allocation1 + $0x1] sm:$0x1]   ;;  %v6_v2 = vld [vmem:[#allocation1] sm:$0x1]  }
   0xa   :  { %11 = vrot.lane.b32.xlu0 %v10_v1, %s22_s0  ;;  %8 = vst.msk [vmem:[#allocation0] sm:$0x1] %vm7_vm0, %v6_v2  }
  0x7c   :  { %v12_v3 = vpop.permute.xlu0 %11  }
  0x7d   :  { %14 = vst.msk [vmem:[#allocation0] sm:$0x1] %vm13_vm1, %v12_v3  }
  0x84   :  { %v18_v4 = vld [vmem:[#allocation0] sm:$0x1] }
  0x85   :  { %20 = vst [vmem:[%s40_s1] sm:$0x1] %v18_v4 }

// kernel: forward.5
= control target key start
LH: loop header
LB: loop body
LE: loop exit
PB: predicated region body
PF: predicated region fallthrough
CT: control target
= control target key end

     0   :  { %v505_v0 = vmov 0   ;;  %vm46_vm0 = vcmask 1041408   ;;  %v506_v4 = vmov 0.0   ;;  %vm507_vm1 = vmmov 0   ;;  %s661_s1 = inlined_call_operand.vmem [shape: f32[16,1], index: 1, kind: input, shape index: {}]   ;;  %s662_s3 = inlined_call_operand.vmem [shape: bf16[4,32], index: 3, kind: input, shape index: {}]   ;;  %s663_s0 = inlined_call_operand.vmem [shape: bf16[16,4], index: 0, kind: input, shape index: {}]   ;;  %s664_s5 = inlined_call_operand.vmem [shape: bf16[16,32], index: 5, kind: input, shape index: {}]   ;;  %s665_s2 = inlined_call_operand.vmem [shape: f32[1,16], index: 2, kind: input, shape index: {}]   ;;  %s666_s4 = inlined_call_operand.vmem [shape: f32[1,32], index: 4, kind: input, shape index: {}]   ;;  %s667_s6 = inlined_call_operand.vmem [shape: f32[1,32], index: 6, kind: input, shape index: {}]   ;;  %s668_s7 = inlined_call_operand.vmem [shape: bf16[16,32], index: 7, kind: output, shape index: {}]  }
   0x1   :  { %486 = vset.pattern.permute.xlu0 %v505_v0  ;;  %v91_v1 = vld [vmem:[%s661_s1] sm:$0xff]  ;;  %v92_v2 = vld [vmem:[%s661_s1 + $0x8] sm:$0xff]  ;;  %457 = vmatprep.subr.bf16.mxu0 %v506_v4  ;;  %vm42_vm2 = vcmask 31744   ;;  %v508_v29 = vmov 683565275  }
   0x2   :  { %96 = vperm.xlu0 %486, %v91_v1   ;;  %v29_v3 = vld [vmem:[%s662_s3] sm:$0x3]  ;;  %463 = vmatprep.subr.bf16.mxu1 %v506_v4  ;;  %v509_v33 = vmov 2475754826   ;;  %v510_v35 = vmov 2131351028  }
   0x3   :  { %v48_v5 = vsel %vm46_vm0, %v29_v3, 0  ;;  %v487_v6 = vld [vmem:[%s663_s0] sm:$0xff]   ;;  %459 = vmatprep.mubr.msk.bf16.mxu0 %vm507_vm1, %v506_v4  ;;  %465 = vmatprep.mubr.msk.bf16.mxu1 %vm507_vm1, %v506_v4  ;;  %v511_v37 = vmov 2102212464   ;;  %v512_v39 = vmov 920167782  }
   0x4   :  { %458 = vmatpush3.bf16.msra.mxu0 %v48_v5  ;;  %v488_v7 = vld [vmem:[%s664_s5] sm:$0xff]   ;;  %v513_v46 = vmov 1326507024  }
   0x5   :  { %464 = vmatpush3.bf16.msra.mxu1 %v488_v7  ;;  %v437_v8 = vld [vmem:[%s665_s2] ss:$0 sm:$0xff] }
   0x6   :  { %101 = vperm.xlu0 %486, %v92_v2  }
   0x7   :  { %460 = vmatmul.mubr.msk.bf16.vlgmr.msra.gmra.mrb[0].mxu0 %vm42_vm2, %v487_v6 }
  0x81   :  { %v97_v9 = vpop.permute.xlu0 %96 }
  0x82   :  { %v572_v10 = vmul.f32 %v437_v8, %v97_v9 }
  0x84   :  { %v112_v11 = vand.u32 2147483647, %v572_v10  ;;  %v115_v12 = vand.u32 2139095040, %v572_v10  ;;  %vm114_vm1 = vcmp.lt.s32.totalorder %v572_v10, 0 }
  0x85   :  { %v102_v13 = vpop.permute.xlu0 %101 }
  0x86   :  { %v116_v14 = vshrl.u32 %v115_v12, 23  ;;  %v576_v15 = vmul.f32 %v437_v8, %v102_v13  ;;  %v119_v16 = vand.u32 8388607, %v112_v11  ;;  %vm630_vm2 = vcmp.le.f32.partialorder %v112_v11, 0.7853982 }
  0x88   :  { %v438_v17 = vadd.s32 4294967169, %v116_v14  ;;  %v219_v18 = vand.u32 2139095040, %v576_v15  ;;  %v120_v20 = vor.u32 8388608, %v119_v16  ;;  %v216_v22 = vand.u32 2147483647, %v576_v15 }
  0x8a   :  { %v122_v19 = vadd.s32 1, %v438_v17  ;;  %v220_v21 = vshrl.u32 %v219_v18, 23  ;;  %v582_v27 = vshll.u32 %v120_v20, 8  ;;  %v223_v31 = vand.u32 8388607, %v216_v22 }
  0x8c   :  { %vm123_vm3 = vcmp.gt.s32.totalorder %v122_v19, 0  ;;  %v442_v24 = vadd.s32 4294967169, %v220_v21  ;;  %v224_v61 = vor.u32 8388608, %v223_v31 }
  0x8d   :  { %v124_v23 = vsel %vm123_vm3, %v122_v19, 0  ;;  %vm218_vm3 = vcmp.lt.s32.totalorder %v576_v15, 0 }
  0x8e   :  { %v125_v25 = vshrl.u32 %v124_v23, 5  ;;  %v126_v26 = vand.u32 31, %v124_v23  ;;  %v226_v32 = vadd.s32 1, %v442_v24  ;;  %v264_v12 = vshll.u32 %v224_v61, 8 }
  0x90   :  { %v127_v28 = vsub.s32 32, %v126_v26  ;;  %v129_v30 = vshll.u32 %v508_v29, %v126_v26  ;;  %v132_v34 = vshll.u32 %v509_v33, %v126_v26  ;;  %v135_v36 = vshll.u32 %v510_v35, %v126_v26 }
  0x91   :  { %v138_v38 = vshll.u32 %v511_v37, %v126_v26  ;;  %v141_v40 = vshll.u32 %v512_v39, %v126_v26  ;;  %vm144_vm4 = vcmp.lt.s32.totalorder %v125_v25, 1  ;;  %vm146_vm5 = vcmp.lt.s32.totalorder %v125_v25, 3 }
  0x92   :  { %v130_v41 = vshrl.u32 %v509_v33, %v127_v28  ;;  %v133_v42 = vshrl.u32 %v510_v35, %v127_v28  ;;  %v136_v43 = vshrl.u32 %v511_v37, %v127_v28  ;;  %v128_v44 = vshrl.u32 %v508_v29, %v127_v28 }
  0x93   :  { %v139_v45 = vshrl.u32 %v512_v39, %v127_v28  ;;  %v142_v47 = vshrl.u32 %v513_v46, %v127_v28  ;;  %vm227_vm6 = vcmp.gt.s32.totalorder %v226_v32, 0  ;;  %vm147_vm7 = vcmp.lt.s32.totalorder %v125_v25, 4 }
  0x94   :  { %v131_v48 = vor.u32 %v130_v41, %v129_v30  ;;  %v134_v49 = vor.u32 %v133_v42, %v132_v34  ;;  %v137_v50 = vor.u32 %v136_v43, %v135_v36  ;;  %v228_v53 = vsel %vm227_vm6, %v226_v32, 0 }
  0x95   :  { %v140_v51 = vor.u32 %v139_v45, %v138_v38  ;;  %v143_v52 = vor.u32 %v142_v47, %v141_v40  ;;  %vm145_vm8 = vcmp.lt.s32.totalorder %v125_v25, 2  ;;  %v230_v0 = vand.u32 31, %v228_v53 }
  0x96   :  { %v148_v54 = vsel %vm144_vm4, %v128_v44, %v131_v48  ;;  %v149_v55 = vsel %vm147_vm7, %v137_v50, 2102212464  ;;  %v152_v56 = vsel %vm144_vm4, %v131_v48, %v134_v49  ;;  %v156_v57 = vsel %vm144_vm4, %v134_v49, %v137_v50 }
  0x97   :  { %v150_v58 = vsel %vm146_vm5, %v134_v49, %v149_v55  ;;  %v153_v59 = vsel %vm147_vm7, %v140_v51, 920167782  ;;  %v157_v60 = vsel %vm147_vm7, %v143_v52, 1326507024  ;;  %v229_v8 = vshrl.u32 %v228_v53, 5 }
  0x98   :  { %v154_v62 = vsel %vm146_vm5, %v137_v50, %v153_v59  ;;  %v158_v63 = vsel %vm146_vm5, %v140_v51, %v157_v60  ;;  %v151_v1 = vsel %vm145_vm8, %v148_v54, %v150_v58  ;;  %v231_v9 = vsub.s32 32, %v230_v0 }
  0x99   :  { %v155_v2 = vsel %vm145_vm8, %v152_v56, %v154_v62  ;;  %v159_v3 = vsel %vm145_vm8, %v156_v57, %v158_v63  ;;  %v167_v13 = vmul.u32 %v582_v27, %v151_v1  ;;  %v233_v14 = vshll.u32 %v508_v29, %v230_v0 }
  0x9a   :  { %v595_v4 = vmul.u32.u64.low %v582_v27, %v159_v3  ;;  %v596_v5 = vmul.u32.u64.high %v582_v27, %v159_v3, %v595_v4  ;;  %v599_v6 = vmul.u32.u64.low %v582_v27, %v155_v2  ;;  %v600_v7 = vmul.u32.u64.high %v582_v27, %v155_v2, %v599_v6 }
  0x9b   :  { %v236_v16 = vshll.u32 %v509_v33, %v230_v0  ;;  %v239_v17 = vshll.u32 %v510_v35, %v230_v0  ;;  %v234_v18 = vshrl.u32 %v509_v33, %v231_v9  ;;  %v237_v19 = vshrl.u32 %v510_v35, %v231_v9 }
  0x9c   :  { %v240_v20 = vshrl.u32 %v511_v37, %v231_v9  ;;  %v242_v21 = vshll.u32 %v511_v37, %v230_v0  ;;  %vm169_vm9 = vc.u32 %v596_v5, %v599_v6  ;;  %v170_v23 = vadd.s32 1, %v600_v7 }
  0x9d   :  { %v243_v24 = vshrl.u32 %v512_v39, %v231_v9  ;;  %v245_v25 = vshll.u32 %v512_v39, %v230_v0  ;;  %v235_v26 = vor.u32 %v234_v18, %v233_v14  ;;  %v238_v28 = vor.u32 %v237_v19, %v236_v16 }
  0x9e   :  { %v241_v30 = vor.u32 %v240_v20, %v239_v17  ;;  %v246_v31 = vshrl.u32 %v513_v46, %v231_v9  ;;  %v171_v27 = vsel %vm169_vm9, %v170_v23, %v600_v7  ;;  %vm248_vm10 = vcmp.lt.s32.totalorder %v229_v8, 1 }
  0x9f   :  { %v244_v32 = vor.u32 %v243_v24, %v242_v21  ;;  %vm251_vm11 = vcmp.lt.s32.totalorder %v229_v8, 4  ;;  %v172_v33 = vadd.s32 %v171_v27, %v167_v13  ;;  %vm250_vm12 = vcmp.lt.s32.totalorder %v229_v8, 3 }
  0xa0   :  { %v247_v34 = vor.u32 %v246_v31, %v245_v25  ;;  %v253_v35 = vsel %vm251_vm11, %v241_v30, 2102212464  ;;  %v232_v36 = vshrl.u32 %v508_v29, %v231_v9  ;;  %v256_v37 = vsel %vm248_vm10, %v235_v26, %v238_v28 }
  0xa1   :  { %v257_v38 = vsel %vm251_vm11, %v244_v32, 920167782  ;;  %v260_v40 = vsel %vm248_vm10, %v238_v28, %v241_v30  ;;  %v173_v41 = vadd.s32 536870912, %v172_v33  ;;  %vm249_vm13 = vcmp.lt.s32.totalorder %v229_v8, 2 }
  0xa2   :  { %v258_v39 = vsel %vm250_vm12, %v241_v30, %v257_v38  ;;  %v261_v42 = vsel %vm251_vm11, %v247_v34, 1326507024  ;;  %v252_v43 = vsel %vm248_vm10, %v232_v36, %v235_v26  ;;  %v254_v44 = vsel %vm250_vm12, %v238_v28, %v253_v35 }
  0xa3   :  { %v259_v45 = vsel %vm249_vm13, %v256_v37, %v258_v39  ;;  %v262_v46 = vsel %vm250_vm12, %v244_v32, %v261_v42  ;;  %v610_v47 = vshrl.u32 %v173_v41, 30  ;;  %v255_v53 = vsel %vm249_vm13, %v252_v43, %v254_v44 }
  0xa4   :  { %v263_v48 = vsel %vm249_vm13, %v260_v40, %v262_v46  ;;  %v612_v49 = vmul.u32.u64.low %v264_v12, %v259_v45  ;;  %v613_v50 = vmul.u32.u64.high %v264_v12, %v259_v45, %v612_v49  ;;  %v271_v56 = vmul.u32 %v264_v12, %v255_v53 }
  0xa5   :  { %v615_v51 = vmul.u32.u64.low %v264_v12, %v263_v48  ;;  %v616_v52 = vmul.u32.u64.high %v264_v12, %v263_v48, %v615_v51  ;;  %v175_v29 = vshll.u32 %v610_v47, 30  ;;  %v168_v4 = vadd.s32 %v599_v6, %v596_v5 }
  0xa6   :  { %v274_v55 = vadd.s32 1, %v613_v50  ;;  %v198_v40 = vsub.s32 4, %v610_v47  ;;  %vm217_vm4 = vcmp.le.f32.partialorder %v216_v22, 0.7853982  ;;  %vm204_vm11 = vweird.f32 %v572_v10 }
  0xa7   :  { %v176_v54 = vsub.s32 %v172_v33, %v175_v29  ;;  %vm273_vm14 = vc.u32 %v616_v52, %v612_v49  ;;  %v272_v28 = vadd.s32 %v612_v49, %v616_v52  ;;  %vm308_vm12 = vweird.f32 %v576_v15 }
  0xa8   :  { %v275_v58 = vsel %vm273_vm14, %v274_v55, %v613_v50  ;;  %v199_v11 = vsel %vm114_vm1, %v198_v40, %v610_v47  ;;  %vm336_vm13 = vcmask 130048   ;;  %vm427_vm14 = vcmask 257024  }
  0xa9   :  { %v178_v57 = vsub.s32 0, %v176_v54  ;;  %v276_v59 = vadd.s32 %v275_v58, %v271_v56  ;;  %v201_v45 = vsel %vm630_vm2, 0, %v199_v11 }
  0xaa   :  { %v205_v50 = vadd.s32 3, %v201_v45 }
  0xab   :  { %v439_v60 = vmin.u32 %v178_v57, %v176_v54  ;;  %v277_v61 = vadd.s32 536870912, %v276_v59 }
  0xac   :  { %v206_v53 = vand.u32 3, %v205_v50 }
  0xad   :  { %v180_v62 = vclz %v439_v60  ;;  %v278_v63 = vshrl.u32 %v277_v61, 30 }
  0xae   :  { %vm208_vm5 = vcmp.eq.s32.totalorder %v206_v53, 0  ;;  %vm211_vm6 = vcmp.eq.s32.totalorder %v206_v53, 2  ;;  %vm207_vm7 = vcmp.lt.s32.totalorder %v206_v53, 2 }
  0xaf   :  { %v440_v0 = vadd.s32 4294967294, %v180_v62  ;;  %v279_v1 = vshll.u32 %v278_v63, 30  ;;  %v302_v43 = vsub.s32 4, %v278_v63 }
  0xb1   :  { %vm441_vm15 = vcmp.lt.s32.totalorder %v440_v0, 0  ;;  %v280_v3 = vsub.s32 %v276_v59, %v279_v1  ;;  %v303_v48 = vsel %vm218_vm3, %v302_v43, %v278_v63 }
  0xb2   :  { %v183_v2 = vsel %vm441_vm15, 0, %v440_v0  ;;  %v305_v51 = vsel %vm217_vm4, 0, %v303_v48 }
  0xb3   :  { %v184_v7 = vsub.s32 32, %v183_v2  ;;  %v188_v8 = vsub.s32 4294967266, %v183_v2  ;;  %v282_v9 = vsub.s32 0, %v280_v3  ;;  %v185_v12 = vshll.u32 %v176_v54, %v183_v2 }
  0xb4   :  { %v309_v47 = vadd.s32 3, %v305_v51 }
  0xb5   :  { %v186_v13 = vshrl.u32 %v168_v4, %v184_v7  ;;  %v189_v14 = vadd.s32 127, %v188_v8  ;;  %v443_v16 = vmin.u32 %v282_v9, %v280_v3 }
  0xb6   :  { %v310_v56 = vand.u32 3, %v309_v47 }
  0xb7   :  { %v187_v17 = vor.u32 %v186_v13, %v185_v12  ;;  %v190_v18 = vshll.u32 %v189_v14, 23  ;;  %v284_v19 = vclz %v443_v16  ;;  %v434_v13 = vld [vmem:[%s666_s4] ss:$0 sm:$0xff] }
  0xb8   :  { %vm315_vm8 = vcmp.eq.s32.totalorder %v310_v56, 2  ;;  %vm312_vm9 = vcmp.eq.s32.totalorder %v310_v56, 0  ;;  %vm311_vm10 = vcmp.lt.s32.totalorder %v310_v56, 2 }
  0xb9   :  { %v191_v20 = vor.u32 4788187, %v190_v18  ;;  %v444_v21 = vadd.s32 4294967294, %v284_v19  ;;  %v194_v24 = vcvt.s32.f32 %v187_v17 }
  0xbb   :  { %v192_v23 = vand.u32 2147483647, %v191_v20  ;;  %vm445_vm0 = vcmp.lt.s32.totalorder %v444_v21, 0  ;;  %v446_v20 = vld [vmem:[%s667_s6] ss:$0 sm:$0xff] }
  0xbc   :  { %v287_v26 = vsel %vm445_vm0, 0, %v444_v21 }
  0xbd   :  { %v195_v25 = vmul.f32 %v194_v24, %v192_v23  ;;  %v288_v5 = vsub.s32 32, %v287_v26  ;;  %v292_v6 = vsub.s32 4294967266, %v287_v26  ;;  %v289_v31 = vshll.u32 %v280_v3, %v287_v26 }
  0xbf   :  { %v196_v30 = vxor.u32 2147483648, %v195_v25  ;;  %v290_v27 = vshrl.u32 %v272_v28, %v288_v5  ;;  %v293_v32 = vadd.s32 127, %v292_v6 }
  0xc1   :  { %v197_v33 = vsel %vm114_vm1, %v196_v30, %v195_v25  ;;  %v291_v35 = vor.u32 %v290_v27, %v289_v31  ;;  %v294_v36 = vshll.u32 %v293_v32, 23 }
  0xc2   :  { %v200_v37 = vsel %vm630_vm2, %v572_v10, %v197_v33 }
  0xc3   :  { %v295_v38 = vor.u32 4788187, %v294_v36  ;;  %489 = vcosq.f32 %v200_v37  ;;  %v298_v39 = vcvt.s32.f32 %v291_v35 }
  0xc4   :  { %491 = vsinq.f32 %v200_v37 }
  0xc5   :  { %v296_v41 = vand.u32 2147483647, %v295_v38 }
  0xc7   :  { %v299_v42 = vmul.f32 %v298_v39, %v296_v41 }
  0xc9   :  { %v300_v44 = vxor.u32 2147483648, %v299_v42 }
  0xcb   :  { %v301_v46 = vsel %vm218_vm3, %v300_v44, %v299_v42 }
  0xcc   :  { %v304_v49 = vsel %vm217_vm4, %v576_v15, %v301_v46 }
  0xcd   :  { %493 = vcosq.f32 %v304_v49  ;;  %v490_v52 = vpop.eup %489 }
  0xce   :  { %495 = vsinq.f32 %v304_v49  ;;  %v492_v29 = vpop.eup %491  ;;  %v212_v55 = vxor.u32 2147483648, %v490_v52 }
  0xcf   :  { %v209_v54 = vxor.u32 2147483648, %v492_v29 }
  0xd0   :  { %v213_v22 = vsel %vm211_vm6, %v212_v55, %v492_v29 }
  0xd1   :  { %v210_v58 = vsel %vm208_vm5, %v490_v52, %v209_v54 }
  0xd2   :  { %v214_v62 = vsel %vm207_vm7, %v210_v58, %v213_v22 }
  0xd3   :  { %v215_v2 = vsel %vm204_vm11, nan, %v214_v62 }
  0xd7   :  { %v494_v57 = vpop.eup %493 }
  0xd8   :  { %v496_v59 = vpop.eup %495  ;;  %v316_v60 = vxor.u32 2147483648, %v494_v57 }
  0xd9   :  { %v313_v61 = vxor.u32 2147483648, %v496_v59 }
  0xda   :  { %v317_v63 = vsel %vm315_vm8, %v316_v60, %v496_v59  ;;  %v84_v7 = vpop.f32.mrb[0].mxu0 }
  0xdb   :  { %v314_v0 = vsel %vm312_vm9, %v494_v57, %v313_v61  ;;  %v461_v8 = vpop.f32.mrb[1].mxu0  ;;  %v85_v14 = vadd.f32 %v434_v13, %v84_v7 }
  0xdc   :  { %v318_v1 = vsel %vm311_vm10, %v314_v0, %v317_v63  ;;  %v87_v9 = vpop.f32.mrb[2].mxu0 }
  0xdd   :  { %v319_v3 = vsel %vm308_vm12, nan, %v318_v1  ;;  %v462_v12 = vpop.f32.mrb[3].mxu0  ;;  %v88_v16 = vadd.f32 %v434_v13, %v87_v9  ;;  %v383_v17 = vmul.f32 0.044715, %v85_v14  ;;  %v381_v11 = vmul.f32 0.5, %v85_v14 }
  0xde   :  { %v320_v4 = vpack.c.bf16 %v319_v3, %v215_v2 }
  0xdf   :  { %v384_v10 = vmul.f32 0.044715, %v88_v16  ;;  %v385_v18 = vmul.f32 %v383_v17, %v85_v14  ;;  %v382_v46 = vmul.f32 0.5, %v88_v16 }
  0xe0   :  { %466 = vmatmul.mubr.msk.bf16.vlgmr.msra.gmra.mrb[0].mxu1 %vm336_vm13, %v320_v4 }
  0xe1   :  { %v386_v15 = vmul.f32 %v384_v10, %v88_v16  ;;  %v387_v19 = vmul.f32 %v385_v18, %v85_v14 }
  0xe3   :  { %v388_v21 = vmul.f32 %v386_v15, %v88_v16  ;;  %v389_v24 = vadd.f32 %v387_v19, %v85_v14 }
  0xe5   :  { %v390_v5 = vadd.f32 %v388_v21, %v88_v16  ;;  %v391_v27 = vmul.f32 0.7978846, %v389_v24 }
  0xe7   :  { %v392_v34 = vmul.f32 0.7978846, %v390_v5  ;;  %497 = vtanh.f32 %v391_v27 }
  0xe9   :  { %499 = vtanh.f32 %v392_v34 }
  0xf1   :  { %v498_v42 = vpop.eup %497 }
  0xf2   :  { %v395_v44 = vadd.f32 1.0, %v498_v42 }
  0xf3   :  { %v500_v43 = vpop.eup %499 }
  0xf4   :  { %v396_v48 = vadd.f32 1.0, %v500_v43  ;;  %v397_v52 = vmul.f32 %v395_v44, %v381_v11 }
  0xf6   :  { %v398_v54 = vmul.f32 %v396_v48, %v382_v46 }
 0x1b3   :  { %v374_v23 = vpop.f32.mrb[0].mxu1 }
 0x1b4   :  { %v375_v25 = vadd.f32 %v446_v20, %v374_v23  ;;  %v467_v26 = vpop.f32.mrb[1].mxu1 }
 0x1b5   :  { %v377_v28 = vpop.f32.mrb[2].mxu1 }
 0x1b6   :  { %v401_v6 = vmul.f32 0.044715, %v375_v25  ;;  %v378_v30 = vadd.f32 %v446_v20, %v377_v28  ;;  %v468_v31 = vpop.f32.mrb[3].mxu1  ;;  %v399_v49 = vmul.f32 0.5, %v375_v25 }
 0x1b8   :  { %v403_v32 = vmul.f32 %v401_v6, %v375_v25  ;;  %v402_v33 = vmul.f32 0.044715, %v378_v30  ;;  %v400_v47 = vmul.f32 0.5, %v378_v30 }
 0x1ba   :  { %v405_v35 = vmul.f32 %v403_v32, %v375_v25  ;;  %v404_v36 = vmul.f32 %v402_v33, %v378_v30 }
 0x1bc   :  { %v407_v37 = vadd.f32 %v405_v35, %v375_v25  ;;  %v406_v38 = vmul.f32 %v404_v36, %v378_v30 }
 0x1be   :  { %v409_v40 = vmul.f32 0.7978846, %v407_v37  ;;  %v408_v41 = vadd.f32 %v406_v38, %v378_v30 }
 0x1c0   :  { %501 = vtanh.f32 %v409_v40  ;;  %v410_v39 = vmul.f32 0.7978846, %v408_v41 }
 0x1c2   :  { %503 = vtanh.f32 %v410_v39 }
 0x1ca   :  { %v502_v45 = vpop.eup %501 }
 0x1cb   :  { %v413_v50 = vadd.f32 1.0, %v502_v45 }
 0x1cc   :  { %v504_v51 = vpop.eup %503 }
 0x1cd   :  { %v415_v29 = vmul.f32 %v413_v50, %v399_v49  ;;  %v414_v53 = vadd.f32 1.0, %v504_v51 }
 0x1cf   :  { %v417_v55 = vadd.f32 %v415_v29, %v397_v52  ;;  %v416_v56 = vmul.f32 %v414_v53, %v400_v47 }
 0x1d1   :  { %v451_v57 = vpack.c.bf16 %v417_v55, %v417_v55  ;;  %v418_v58 = vadd.f32 %v416_v56, %v398_v54 }
 0x1d3   :  { %428 = vst.msk [vmem:[%s668_s7] sm:$0xf] %vm427_vm14, %v451_v57  ;;  %v452_v22 = vpack.c.bf16 %v418_v58, %v418_v58 }
 0x1d5   :  { %429 = vst.msk [vmem:[%s668_s7 + $0x4] sm:$0xf] %vm427_vm14, %v452_v22 }

// kernel: forward.6
= control target key start
LH: loop header
LB: loop body
LE: loop exit
PB: predicated region body
PF: predicated region fallthrough
CT: control target
= control target key end

     0   :  { %vm63_vm0 = vcmask 1046528   ;;  %v323_v0 = vmov 0.0   ;;  %vm324_vm1 = vmmov 0   ;;  %vm53_vm2 = vcmask 113664   ;;  %s407_s1 = inlined_call_operand.vmem [shape: bf16[14,32], index: 1, kind: input, shape index: {}]   ;;  %s408_s0 = inlined_call_operand.vmem [shape: bf16[36,14], index: 0, kind: input, shape index: {}]   ;;  %s409_s3 = inlined_call_operand.vmem [shape: bf16[32,32], index: 3, kind: input, shape index: {}]   ;;  %s410_s2 = inlined_call_operand.vmem [shape: f32[1,32], index: 2, kind: input, shape index: {}]   ;;  %s411_s4 = inlined_call_operand.vmem [shape: f32[1,32], index: 4, kind: input, shape index: {}]   ;;  %s412_s5 = inlined_call_operand.vmem [shape: bf16[36,32], index: 5, kind: output, shape index: {}]  }
   0x1   :  { %285 = vmatprep.subr.bf16.mxu0 %v323_v0  ;;  %v317_v1 = vld [vmem:[%s407_s1] sm:$0x7f]   ;;  %287 = vmatprep.mubr.msk.bf16.mxu0 %vm324_vm1, %v323_v0  ;;  %v319_v4 = vld [vmem:[%s408_s0 + $0x8] sm:$0xff]   ;;  %v320_v5 = vld [vmem:[%s408_s0 + $0x10] ss:$0 sps:$4 sm:$0x33]  }
   0x2   :  { %299 = vmatprep.subr.bf16.mxu1 %v323_v0  ;;  %303 = vmatprep.mubr.msk.bf16.mxu1 %vm324_vm1, %v323_v0  ;;  %v65_v2 = vsel %vm63_vm0, %v317_v1, 0  ;;  %v318_v3 = vld [vmem:[%s408_s0] sm:$0xff]   ;;  %v322_v7 = vld [vmem:[%s409_s3 + $0x8] sm:$0xff]   ;;  %vm154_vm3 = vcmask 261120   ;;  %vm241_vm4 = vcmask 257024   ;;  %vm246_vm5 = vcmask 254976  }
   0x3   :  { %286 = vmatpush3.bf16.msra.mxu0 %v65_v2  ;;  %v321_v6 = vld [vmem:[%s409_s3] sm:$0xff]  }
   0x4   :  { %300 = vmatpush3.bf16.msra.mxu1 %v321_v6  ;;  %v252_v8 = vld [vmem:[%s410_s2] ss:$0 sm:$0xff] }
   0x5   :  { %301 = vmatprep.subr.bf16.mxu1 %v323_v0  ;;  %v260_v34 = vld [vmem:[%s411_s4] ss:$0 sm:$0xff] }
   0x6   :  { %288 = vmatmul.mubr.msk.bf16.vlgmr.msra.gmra.mrb[0].mxu0 %vm53_vm2, %v318_v3 }
   0x7   :  { %291 = vmatprep.mubr.msk.bf16.mxu0 %vm324_vm1, %v323_v0 }
   0x8   :  { %302 = vmatpush3.bf16.msra.mxu1 %v322_v7 }
   0xe   :  { %292 = vmatmul.mubr.msk.bf16.gmra.mrb[4].mxu0 %vm53_vm2, %v319_v4 }
   0xf   :  { %295 = vmatprep.mubr.msk.bf16.mxu0 %vm324_vm1, %v323_v0 }
  0x16   :  { %296 = vmatmul.mubr.msk.bf16.gmra.mrb[8].mxu0 %vm53_vm2, %v320_v5 }
  0xd9   :  { %v101_v9 = vpop.f32.mrb[0].mxu0 }
  0xda   :  { %v102_v10 = vadd.f32 %v252_v8, %v101_v9  ;;  %v289_v11 = vpop.f32.mrb[1].mxu0 }
  0xdb   :  { %v104_v12 = vpop.f32.mrb[2].mxu0 }
  0xdc   :  { %v105_v13 = vadd.f32 %v252_v8, %v104_v12  ;;  %v290_v14 = vpop.f32.mrb[3].mxu0  ;;  %v123_v15 = vmax.f32 %v102_v10, 0.0 }
  0xde   :  { %v124_v16 = vmax.f32 %v105_v13, 0.0 }
  0xe0   :  { %v128_v17 = vpack.c.bf16 %v124_v16, %v123_v15 }
  0xe1   :  { %v109_v18 = vpop.f32.mrb[4].mxu0 }
  0xe2   :  { %v110_v19 = vadd.f32 %v252_v8, %v109_v18  ;;  %v293_v20 = vpop.f32.mrb[5].mxu0  ;;  %304 = vmatmul.mubr.msk.bf16.vlgmr.msra.gmra.mrb[0].mxu1 %vm154_vm3, %v128_v17 }
  0xe3   :  { %v112_v21 = vpop.f32.mrb[6].mxu0  ;;  %307 = vmatprep.mubr.msk.bf16.mxu1 %vm324_vm1, %v323_v0 }
  0xe4   :  { %v113_v22 = vadd.f32 %v252_v8, %v112_v21  ;;  %v294_v23 = vpop.f32.mrb[7].mxu0  ;;  %v125_v24 = vmax.f32 %v110_v19, 0.0 }
  0xe6   :  { %v126_v25 = vmax.f32 %v113_v22, 0.0 }
  0xe8   :  { %v129_v26 = vpack.c.bf16 %v126_v25, %v125_v24 }
  0xe9   :  { %v117_v27 = vpop.f32.mrb[8].mxu0 }
  0xea   :  { %v118_v28 = vadd.f32 %v252_v8, %v117_v27  ;;  %v297_v29 = vpop.f32.mrb[9].mxu0  ;;  %308 = vmatmul.mubr.msk.bf16.gmra.mrb[4].mxu1 %vm154_vm3, %v129_v26 }
  0xeb   :  { %v120_v30 = vpop.f32.mrb[10].mxu0  ;;  %311 = vmatprep.mubr.msk.bf16.mxu1 %vm324_vm1, %v323_v0 }
  0xec   :  { %v127_v31 = vmax.f32 %v118_v28, 0.0  ;;  %v298_v32 = vpop.f32.mrb[11].mxu0 }
  0xee   :  { %v130_v33 = vpack.c.bf16 %v127_v31, %v127_v31 }
  0xf2   :  { %312 = vmatmul.mubr.msk.bf16.gmra.mrb[8].mxu1 %vm154_vm3, %v130_v33 }
 0x1b5   :  { %v198_v35 = vpop.f32.mrb[0].mxu1 }
 0x1b6   :  { %v199_v36 = vadd.f32 %v260_v34, %v198_v35  ;;  %v305_v37 = vpop.f32.mrb[1].mxu1 }
 0x1b7   :  { %v201_v38 = vpop.f32.mrb[2].mxu1 }
 0x1b8   :  { %v271_v39 = vpack.c.bf16 %v199_v36, %v199_v36  ;;  %v202_v40 = vadd.f32 %v260_v34, %v201_v38  ;;  %v306_v41 = vpop.f32.mrb[3].mxu1 }
 0x1ba   :  { %242 = vst.msk [vmem:[%s412_s5] sm:$0xf] %vm241_vm4, %v271_v39  ;;  %v272_v42 = vpack.c.bf16 %v202_v40, %v202_v40 }
 0x1bc   :  { %243 = vst.msk [vmem:[%s412_s5 + $0x4] sm:$0xf] %vm241_vm4, %v272_v42 }
 0x1bd   :  { %v206_v43 = vpop.f32.mrb[4].mxu1 }
 0x1be   :  { %v207_v44 = vadd.f32 %v260_v34, %v206_v43  ;;  %v309_v45 = vpop.f32.mrb[5].mxu1 }
 0x1bf   :  { %v209_v46 = vpop.f32.mrb[6].mxu1 }
 0x1c0   :  { %v273_v47 = vpack.c.bf16 %v207_v44, %v207_v44  ;;  %v210_v48 = vadd.f32 %v260_v34, %v209_v46  ;;  %v310_v49 = vpop.f32.mrb[7].mxu1 }
 0x1c2   :  { %244 = vst.msk [vmem:[%s412_s5 + $0x8] sm:$0xf] %vm241_vm4, %v273_v47  ;;  %v274_v50 = vpack.c.bf16 %v210_v48, %v210_v48 }
 0x1c4   :  { %245 = vst.msk [vmem:[%s412_s5 + $0xc] sm:$0xf] %vm241_vm4, %v274_v50 }
 0x1c5   :  { %v214_v51 = vpop.f32.mrb[8].mxu1 }
 0x1c6   :  { %v215_v52 = vadd.f32 %v260_v34, %v214_v51  ;;  %v313_v53 = vpop.f32.mrb[9].mxu1 }
 0x1c7   :  { %v217_v54 = vpop.f32.mrb[10].mxu1 }
 0x1c8   :  { %v275_v55 = vpack.c.bf16 %v215_v52, %v215_v52  ;;  %v314_v56 = vpop.f32.mrb[11].mxu1 }
 0x1ca   :  { %247 = vst.msk [vmem:[%s412_s5 + $0x10] sm:$0x3] %vm246_vm5, %v275_v55 }

// kernel: forward.9
= control target key start
LH: loop header
LB: loop body
LE: loop exit
PB: predicated region body
PF: predicated region fallthrough
CT: control target
= control target key end

     0   :  { %v285_v1 = vmov 0.0   ;;  %vm286_vm0 = vmmov 0   ;;  %vm55_vm1 = vcmask 261120   ;;  %s365_s0 = inlined_call_operand.vmem [shape: bf16[16,32], index: 0, kind: input, shape index: {}]   ;;  %s366_s1 = inlined_call_operand.vmem [shape: bf16[16,32], index: 1, kind: input, shape index: {}]   ;;  %s367_s2 = inlined_call_operand.vmem [shape: bf16[32,32], index: 2, kind: input, shape index: {}]   ;;  %s368_s3 = inlined_call_operand.vmem [shape: f32[1,32], index: 3, kind: input, shape index: {}]   ;;  %s369_s4 = inlined_call_operand.vmem [shape: bf16[32,32], index: 4, kind: input, shape index: {}]   ;;  %s370_s5 = inlined_call_operand.vmem [shape: f32[1,32], index: 5, kind: input, shape index: {}]   ;;  %s371_s6 = inlined_call_operand.hbm [shape: f32[16,32], index: 6, kind: output, shape index: {}]  }
   0x1   :  { %v251_v0 = vld [vmem:[%s367_s2] sm:$0xff]   ;;  %230 = vmatprep.subr.bf16.mxu0 %v285_v1  ;;  %238 = vmatprep.subr.bf16.mxu1 %v285_v1  ;;  %v253_v3 = vld [vmem:[%s367_s2 + $0x8] sm:$0xff]  }
   0x2   :  { %v252_v2 = vld [vmem:[%s369_s4] sm:$0xff]   ;;  %231 = vmatpush3.bf16.msra.mxu0 %v251_v0  ;;  %234 = vmatprep.mubr.msk.bf16.mxu0 %vm286_vm0, %v285_v1  ;;  %v254_v4 = vld [vmem:[%s369_s4 + $0x8] sm:$0xff]  }
   0x3   :  { %239 = vmatpush3.bf16.msra.mxu1 %v252_v2  ;;  %232 = vmatprep.subr.bf16.mxu0 %v285_v1  ;;  %v255_v5 = vld [vmem:[%s365_s0] sm:$0xff]  }
   0x4   :  { %240 = vmatprep.subr.bf16.mxu1 %v285_v1  ;;  %242 = vmatprep.mubr.msk.bf16.mxu1 %vm286_vm0, %v285_v1  ;;  %v256_v6 = vld [vmem:[%s366_s1] sm:$0xff]  }
   0x6   :  { %233 = vmatpush3.bf16.msra.mxu0 %v253_v3 }
   0x7   :  { %11 = vsyncpa [#allocation3], 0  ;;  %241 = vmatpush3.bf16.msra.mxu1 %v254_v4  ;;  %v214_v7 = vld [vmem:[%s368_s3] ss:$0 sm:$0xff]  ;;  %s287_s1 = smov [#allocation2]  }
   0x8   :  { %v223_v12 = vld [vmem:[%s370_s5] ss:$0 sm:$0xff]  ;;  %s203_s3 = sshll.u32 %s287_s1, 4  ;;  %s204_s3 = int_to_ptr.vmem [resolvable:$true] %s203_s3 }
   0x9   :  { %235 = vmatmul.mubr.msk.bf16.vlgmr.msra.gmra.mrb[0].mxu0 %vm55_vm1, %v255_v5  ;;  %s261_s5 = scalar_lea.vmem %s204_s3, 256  ;;  %p266_p1 = scmp.lt.s32.totalorder %s204_s3, %s204_s3 }
   0xa   :  { %243 = vmatmul.mubr.msk.bf16.vlgmr.msra.gmra.mrb[0].mxu1 %vm55_vm1, %v256_v6  ;;  %p262_p0 = scmp.ne.s32.totalorder %s204_s3, %s261_s5  ;;  %p267_p2 = scmp.lt.s32.totalorder %s261_s5, %s261_s5 }
   0xc   :  { %p268_p3 = por %p267_p2, %p266_p1 }
   0xe   :  { %p269_p4 = pnand %p268_p3, %p262_p0 }
  0xdc   :  { %v93_v8 = vpop.f32.mrb[0].mxu0 }
  0xdd   :  { %v94_v9 = vadd.f32 %v214_v7, %v93_v8  ;;  %v160_v10 = vpop.f32.mrb[0].mxu1  ;;  %v236_v11 = vpop.f32.mrb[1].mxu0 }
  0xde   :  { %v244_v13 = vpop.f32.mrb[1].mxu1  ;;  %v96_v14 = vpop.f32.mrb[2].mxu0 }
  0xdf   :  { %v167_v15 = vadd.f32 %v160_v10, %v94_v9  ;;  %v97_v16 = vadd.f32 %v214_v7, %v96_v14  ;;  %v163_v17 = vpop.f32.mrb[2].mxu1  ;;  %v237_v18 = vpop.f32.mrb[3].mxu0 }
  0xe0   :  { %v245_v19 = vpop.f32.mrb[3].mxu1 }
  0xe1   :  { %v176_v20 = vadd.f32 %v223_v12, %v167_v15  ;;  %v168_v21 = vadd.f32 %v163_v17, %v97_v16 }
  0xe3   :  { %v180_v22 = vmul.f32 0.044715, %v176_v20  ;;  %v177_v23 = vadd.f32 %v223_v12, %v168_v21  ;;  %v178_v34 = vmul.f32 0.5, %v176_v20 }
  0xe5   :  { %v182_v24 = vmul.f32 %v180_v22, %v176_v20  ;;  %v181_v25 = vmul.f32 0.044715, %v177_v23  ;;  %v179_v37 = vmul.f32 0.5, %v177_v23 }
  0xe7   :  { %v184_v26 = vmul.f32 %v182_v24, %v176_v20  ;;  %v183_v27 = vmul.f32 %v181_v25, %v177_v23 }
  0xe9   :  { %v186_v28 = vadd.f32 %v184_v26, %v176_v20  ;;  %v185_v29 = vmul.f32 %v183_v27, %v177_v23 }
  0xeb   :  { %v188_v30 = vmul.f32 0.7978846, %v186_v28  ;;  %v187_v31 = vadd.f32 %v185_v29, %v177_v23 }
  0xed   :  { %v189_v32 = vmul.f32 0.7978846, %v187_v31  ;;  %257 = vtanh.f32 %v188_v30 }
  0xef   :  { %259 = vtanh.f32 %v189_v32 }
  0xf7   :  { %v258_v33 = vpop.eup %257 }
  0xf8   :  { %v192_v35 = vadd.f32 1.0, %v258_v33 }
  0xf9   :  { %v260_v36 = vpop.eup %259 }
  0xfa   :  { %v193_v38 = vadd.f32 1.0, %v260_v36  ;;  %v194_v39 = vmul.f32 %v192_v35, %v178_v34 }
  0xfc   :  { %v195_v40 = vmul.f32 %v193_v38, %v179_v37  ;;  %196 = vst.msk [vmem:[#allocation2] sm:$0xff] %vm55_vm1, %v194_v39 }
  0xfe   :  { %197 = vst.msk [vmem:[#allocation2 + $0x8] sm:$0xff] %vm55_vm1, %v195_v40 }
  0xff   :  { %272 = shalt.err (!%p269_p4)
}
 0x100   :  { %s273_s12 = scalar_lea.hbm %s371_s6, 256 }
 0x101   :  { %p274_p5 = scmp.ne.s32.totalorder %s371_s6, %s273_s12  ;;  %p277_p6 = scmp.lt.u32.totalorder %s273_s12, %s371_s6 }
 0x103   :  { %p279_p7 = pnand %p277_p6, %p274_p5 }
 0x105   :  { %282 = shalt.err (!%p279_p7)
}
 0x106   :  { %s288_s17 = smov 128   ;;  %s289_s18 = smov 8  }
 0x107   :  { %209 = dma.vmem_to_hbm [thread:$0]  %s204_s3, 256, %s371_s6, [#allocation3], %s288_s17, %s288_s17, %s289_s18  }
 0x108   :  { %283 = dma.done.wait [#allocation3], 256  }
 0x109   :  { %284 = vsyncadd [#allocation3], 4294967040 }
 0x10a   :  { %213 = vsyncpa [#allocation3], 1 }

// kernel: forward.7
= control target key start
LH: loop header
LB: loop body
LE: loop exit
PB: predicated region body
PF: predicated region fallthrough
CT: control target
= control target key end

     0   :  { %v1904_v0 = vmov 0.0   ;;  %vm1905_vm0 = vmmov 0   ;;  %vm119_vm1 = vcmask 261120   ;;  %vm570_vm2 = vcmask 130048   ;;  %s2388_s7 = inlined_call_operand.vmem [shape: bf16[32,32], index: 7, kind: input, shape index: {}]   ;;  %s2389_s11 = inlined_call_operand.vmem [shape: bf16[32,32], index: 11, kind: input, shape index: {}]   ;;  %s2390_s1 = inlined_call_operand.vmem [shape: bf16[16,32], index: 1, kind: input, shape index: {}]   ;;  %s2391_s6 = inlined_call_operand.vmem [shape: bf16[32,32], index: 6, kind: input, shape index: {}]   ;;  %s2392_s10 = inlined_call_operand.vmem [shape: bf16[32,32], index: 10, kind: input, shape index: {}]   ;;  %s2393_s0 = inlined_call_operand.vmem [shape: bf16[16,32], index: 0, kind: input, shape index: {}]   ;;  %s2394_s15 = inlined_call_operand.vmem [shape: bf16[32,32], index: 15, kind: input, shape index: {}]   ;;  %s2395_s14 = inlined_call_operand.vmem [shape: bf16[32,32], index: 14, kind: input, shape index: {}]   ;;  %s2396_s8 = inlined_call_operand.vmem [shape: bf16[32,32], index: 8, kind: input, shape index: {}]   ;;  %s2397_s2 = inlined_call_operand.vmem [shape: bf16[36,32], index: 2, kind: input, shape index: {}]   ;;  %s2398_s12 = inlined_call_operand.vmem [shape: bf16[32,32], index: 12, kind: input, shape index: {}]   ;;  %s2399_s4 = inlined_call_operand.vmem [shape: bf16[36,16], index: 4, kind: input, shape index: {}]   ;;  %s2400_s3 = inlined_call_operand.vmem [shape: bf16[36,16], index: 3, kind: input, shape index: {}]   ;;  %s2401_s16 = inlined_call_operand.vmem [shape: f32[1,32], index: 16, kind: input, shape index: {}]   ;;  %s2402_s17 = inlined_call_operand.vmem [shape: bf16[32,4], index: 17, kind: input, shape index: {}]   ;;  %s2403_s9 = inlined_call_operand.vmem [shape: f32[1,32], index: 9, kind: input, shape index: {}]   ;;  %s2404_s5 = inlined_call_operand.vmem [shape: f32[36,1], index: 5, kind: input, shape index: {}]   ;;  %s2405_s18 = inlined_call_operand.vmem [shape: bf16[4,32], index: 18, kind: input, shape index: {}]   ;;  %s2406_s19 = inlined_call_operand.vmem [shape: bf16[32,32], index: 19, kind: input, shape index: {}]   ;;  %s2407_s13 = inlined_call_operand.vmem [shape: f32[1,32], index: 13, kind: input, shape index: {}]   ;;  %s2408_s21 = inlined_call_operand.vmem [shape: bf16[32,32], index: 21, kind: input, shape index: {}]   ;;  %s2409_s20 = inlined_call_operand.vmem [shape: f32[1,32], index: 20, kind: input, shape index: {}]   ;;  %s2410_s22 = inlined_call_operand.vmem [shape: f32[1,32], index: 22, kind: input, shape index: {}]   ;;  %s2411_s23 = inlined_call_operand.vmem [shape: bf16[16,32], index: 23, kind: output, shape index: {}]  }
   0x1   :  { %2418 = sst [smem:[#allocation2_spill]] %s2388_s7  ;;  %1632 = vmatprep.subr.bf16.mxu0 %v1904_v0  ;;  %1648 = vmatprep.subr.bf16.mxu1 %v1904_v0  ;;  %v1861_v15 = vld [vmem:[%s2396_s8] sm:$0xff]   ;;  %v1862_v16 = vld [vmem:[%s2396_s8 + $0x8] sm:$0xff]   ;;  %v1865_v21 = vld [vmem:[%s2397_s2 + $0x10] ss:$0 sps:$4 sm:$0x33]  }
   0x2   :  { %2419 = sst [smem:[#allocation3_spill]] %s2389_s11  ;;  %s2426_s24 = sld [smem:[#allocation2_spill]]  ;;  %1636 = vmatprep.mubr.msk.bf16.mxu0 %vm1905_vm0, %v1904_v0  ;;  %1652 = vmatprep.mubr.msk.bf16.mxu1 %vm1905_vm0, %v1904_v0  ;;  %v1863_v17 = vld [vmem:[%s2397_s2] sm:$0xff]   ;;  %v1867_v19 = vld [vmem:[%s2398_s12 + $0x8] sm:$0xff]   ;;  %vm962_vm3 = vcmask 31744   ;;  %vm967_vm4 = vcmask 27648  }
   0x3   :  { %2420 = sst [smem:[#allocation4_spill]] %s2390_s1  ;;  %s2427_s11 = sld [smem:[#allocation3_spill]]  ;;  %v1866_v18 = vld [vmem:[%s2398_s12] sm:$0xff]   ;;  %v1864_v20 = vld [vmem:[%s2397_s2 + $0x8] sm:$0xff]   ;;  %vm1020_vm5 = vcmask 1041408   ;;  %vm1016_vm6 = vcmask 293888  }
   0x4   :  { %2421 = sst [smem:[#allocation5_spill]] %s2391_s6  ;;  %s2428_s29 = sld [smem:[#allocation4_spill]]  ;;  %v2151_v22 = vld [vmem:[%s2400_s3] sm:$0xff]   ;;  %v2157_v23 = vld [vmem:[%s2400_s3 + $0x8] sm:$0xff]   ;;  %vm1482_vm7 = vcmask 257024  }
   0x5   :  { %2422 = sst [smem:[#allocation6_spill]] %s2392_s10  ;;  %s2429_s10 = sld [smem:[#allocation5_spill]]  ;;  %1000 = vxpose.xlu0.c.b16.start [1/3] (short) (narrow) %v2151_v22, 16  ;;  %v2163_v24 = vld [vmem:[%s2400_s3 + $0x10] ss:$0 sps:$4 sm:$0x33]  }
   0x6   :  { %2423 = sst [smem:[#allocation7_spill]] %s2393_s0  ;;  %s2430_s25 = sld [smem:[#allocation6_spill]]  ;;  %v2169_v35 = vld [vmem:[%s2399_s4] sm:$0xff]   ;;  %v2183_v47 = vld [vmem:[%s2399_s4 + $0x8] sm:$0xff]  }
   0x7   :  { %2424 = sst [smem:[#allocation8_spill]] %s2394_s15  ;;  %v1509_v42 = vld [vmem:[%s2401_s16] ss:$0 sm:$0xff]  ;;  %v2193_v55 = vld [vmem:[%s2399_s4 + $0x10] ss:$0 sps:$4 sm:$0x33]  }
   0x8   :  { %2425 = sst [smem:[#allocation9_spill]] %s2395_s14  ;;  %v1847_v1 = vld [vmem:[%s2426_s24] sm:$0xff]   ;;  %v1849_v3 = vld [vmem:[%s2426_s24 + $0x8] sm:$0xff]   ;;  %s2431_s14 = sld [smem:[#allocation7_spill]] }
   0x9   :  { %v1848_v2 = vld [vmem:[%s2427_s11] sm:$0xff]   ;;  %1633 = vmatpush3.bf16.msra.mxu0 %v1847_v1  ;;  %v1850_v4 = vld [vmem:[%s2427_s11 + $0x8] sm:$0xff]   ;;  %s2432_s6 = sld [smem:[#allocation8_spill]]  ;;  %s2433_s30 = sld [smem:[#allocation9_spill]]  ;;  %1001 = vxpose.xlu0.c.b16.cont [2/3] (short) (narrow) %v2157_v23, 16 }
   0xa   :  { %1649 = vmatpush3.bf16.msra.mxu1 %v1848_v2  ;;  %1634 = vmatprep.subr.bf16.mxu0 %v1904_v0  ;;  %v1851_v5 = vld [vmem:[%s2428_s29] sm:$0xff]  }
   0xb   :  { %1650 = vmatprep.subr.bf16.mxu1 %v1904_v0  ;;  %v1852_v6 = vld [vmem:[%s2429_s10] sm:$0xff]   ;;  %v1854_v8 = vld [vmem:[%s2429_s10 + $0x8] sm:$0xff]  }
   0xc   :  { %v1853_v7 = vld [vmem:[%s2430_s25] sm:$0xff]   ;;  %v1855_v9 = vld [vmem:[%s2430_s25 + $0x8] sm:$0xff]  }
   0xd   :  { %1635 = vmatpush3.bf16.msra.mxu0 %v1849_v3  ;;  %1002 = vxpose.xlu0.c.b16.end [3/3] (short) (narrow) %v2163_v24, 16 }
   0xe   :  { %1651 = vmatpush3.bf16.msra.mxu1 %v1850_v4  ;;  %1640 = vmatprep.subr.bf16.mxu0 %v1904_v0  ;;  %v1856_v10 = vld [vmem:[%s2431_s14] sm:$0xff]  }
   0xf   :  { %1656 = vmatprep.subr.bf16.mxu1 %v1904_v0  ;;  %v1857_v11 = vld [vmem:[%s2432_s6] sm:$0xff]   ;;  %v1859_v13 = vld [vmem:[%s2432_s6 + $0x8] sm:$0xff]  }
  0x10   :  { %1637 = vmatmul.mubr.msk.bf16.vlgmr.msra.gmra.mrb[0].mxu0 %vm119_vm1, %v1851_v5  ;;  %v1858_v12 = vld [vmem:[%s2433_s30] sm:$0xff]   ;;  %v1860_v14 = vld [vmem:[%s2433_s30 + $0x8] sm:$0xff]  }
  0x11   :  { %1653 = vmatmul.mubr.msk.bf16.vlgmr.msra.gmra.mrb[0].mxu1 %vm119_vm1, %v1851_v5  ;;  %1641 = vmatpush3.bf16.msra.mxu0 %v1852_v6 }
  0x12   :  { %1657 = vmatpush3.bf16.msra.mxu1 %v1853_v7  ;;  %1642 = vmatprep.subr.bf16.mxu0 %v1904_v0 }
  0x13   :  { %1658 = vmatprep.subr.bf16.mxu1 %v1904_v0  ;;  %1644 = vmatprep.mubr.msk.bf16.mxu0 %vm1905_vm0, %v1904_v0 }
  0x14   :  { %1660 = vmatprep.mubr.msk.bf16.mxu1 %vm1905_vm0, %v1904_v0 }
  0x15   :  { %1643 = vmatpush3.bf16.msra.mxu0 %v1854_v8 }
  0x16   :  { %1659 = vmatpush3.bf16.msra.mxu1 %v1855_v9  ;;  %1664 = vmatprep.subr.bf16.mxu0 %v1904_v0 }
  0x17   :  { %1672 = vmatprep.subr.bf16.mxu1 %v1904_v0 }
  0x1c   :  { %1645 = vmatmul.mubr.msk.bf16.vlgmr.msra.gmra.mrb[0].mxu0 %vm119_vm1, %v1856_v10 }
  0x1d   :  { %1661 = vmatmul.mubr.msk.bf16.vlgmr.msra.gmra.mrb[0].mxu1 %vm119_vm1, %v1856_v10  ;;  %1665 = vmatpush3.bf16.msra.mxu0 %v1857_v11 }
  0x1e   :  { %1673 = vmatpush3.bf16.msra.mxu1 %v1858_v12  ;;  %1666 = vmatprep.subr.bf16.mxu0 %v1904_v0 }
  0x1f   :  { %1674 = vmatprep.subr.bf16.mxu1 %v1904_v0  ;;  %1668 = vmatprep.mubr.msk.bf16.mxu0 %vm1905_vm0, %v1904_v0 }
  0x20   :  { %1676 = vmatprep.mubr.msk.bf16.mxu1 %vm1905_vm0, %v1904_v0 }
  0x21   :  { %1667 = vmatpush3.bf16.msra.mxu0 %v1859_v13  ;;  %v1874_v13 = vld [vmem:[%s2402_s17] sm:$0xff]  }
  0x22   :  { %1675 = vmatpush3.bf16.msra.mxu1 %v1860_v14  ;;  %1680 = vmatprep.subr.bf16.mxu0 %v1904_v0  ;;  %v1875_v14 = vld [vmem:[%s2402_s17 + $0x8] sm:$0xff]  }
  0x23   :  { %1696 = vmatprep.subr.bf16.mxu1 %v1904_v0 }
  0x24   :  { %1669 = vmatmul.mubr.msk.bf16.vlgmr.msra.gmra.mrb[4].mxu0 %vm119_vm1, %v1851_v5 }
  0x25   :  { %1677 = vmatmul.mubr.msk.bf16.vlgmr.msra.gmra.mrb[4].mxu1 %vm119_vm1, %v1856_v10  ;;  %1681 = vmatpush3.bf16.msra.mxu0 %v1861_v15 }
  0x26   :  { %1682 = vmatprep.subr.bf16.mxu0 %v1904_v0  ;;  %1684 = vmatprep.mubr.msk.bf16.mxu0 %vm1905_vm0, %v1904_v0 }
  0x27   :  { %1698 = vmatprep.mubr.msk.bf16.mxu1 %vm1905_vm0, %v1904_v0 }
  0x29   :  { %1683 = vmatpush3.bf16.msra.mxu0 %v1862_v16 }
  0x2a   :  { %1710 = vmatprep.subr.bf16.mxu0 %v1904_v0 }
  0x2c   :  { %1685 = vmatmul.mubr.msk.bf16.vlgmr.msra.gmra.mrb[8].mxu0 %vm119_vm1, %v1863_v17 }
  0x2d   :  { %1688 = vmatprep.mubr.msk.bf16.mxu0 %vm1905_vm0, %v1904_v0  ;;  %1711 = vmatpush3.bf16.msra.mxu0 %v1866_v18 }
  0x2e   :  { %1712 = vmatprep.subr.bf16.mxu0 %v1904_v0 }
  0x31   :  { %1713 = vmatpush3.bf16.msra.mxu0 %v1867_v19 }
  0x32   :  { %1740 = vmatprep.subr.bf16.mxu0 %v1904_v0 }
  0x34   :  { %1689 = vmatmul.mubr.msk.bf16.gmra.mrb[12].mxu0 %vm119_vm1, %v1864_v20 }
  0x35   :  { %1692 = vmatprep.mubr.msk.bf16.mxu0 %vm1905_vm0, %v1904_v0 }
  0x3c   :  { %1693 = vmatmul.mubr.msk.bf16.gmra.mrb[16].mxu0 %vm119_vm1, %v1865_v21 }
  0x3d   :  { %1714 = vmatprep.mubr.msk.bf16.mxu0 %vm1905_vm0, %v1904_v0 }
  0x44   :  { %1715 = vmatmul.mubr.msk.bf16.vlgmr.msra.gmra.mrb[20].mxu0 %vm119_vm1, %v1863_v17 }
  0x45   :  { %1718 = vmatprep.mubr.msk.bf16.mxu0 %vm1905_vm0, %v1904_v0 }
  0x4c   :  { %1719 = vmatmul.mubr.msk.bf16.gmra.mrb[24].mxu0 %vm119_vm1, %v1864_v20 }
  0x4d   :  { %1722 = vmatprep.mubr.msk.bf16.mxu0 %vm1905_vm0, %v1904_v0 }
  0x54   :  { %1723 = vmatmul.mubr.msk.bf16.gmra.mrb[28].mxu0 %vm119_vm1, %v1865_v21 }
  0x55   :  { %1742 = vmatprep.mubr.msk.bf16.mxu0 %vm1905_vm0, %v1904_v0 }
  0xef   :  { %v218_v25 = vpop.f32.mrb[0].mxu0 }
  0xf0   :  { %v332_v26 = vpop.f32.mrb[0].mxu1  ;;  %v1646_v27 = vpop.f32.mrb[1].mxu0 }
  0xf1   :  { %v1662_v28 = vpop.f32.mrb[1].mxu1  ;;  %v221_v29 = vpop.f32.mrb[2].mxu0 }
  0xf2   :  { %v462_v30 = vpack.c.bf16 %v221_v29, %v218_v25  ;;  %v335_v31 = vpop.f32.mrb[2].mxu1  ;;  %v1647_v32 = vpop.f32.mrb[3].mxu0  ;;  %v1524_v28 = vld [vmem:[%s2403_s9] ss:$0 sm:$0xff] }
  0xf3   :  { %v648_v33 = vpack.c.bf16 %v335_v31, %v332_v26  ;;  %v1663_v34 = vpop.f32.mrb[3].mxu1 }
  0xf4   :  { %1697 = vmatpush3.bf16.msra.mxu1 %v462_v30 }
  0xf5   :  { %1726 = vmatprep.subr.bf16.mxu1 %v1904_v0 }
  0xf7   :  { %v393_v36 = vpop.f32.mrb[4].mxu0  ;;  %1699 = vmatmul.mubr.msk.bf16.vlgmr.msra.gmra.mrb[8].mxu1 %vm570_vm2, %v2169_v35 }
  0xf8   :  { %v446_v37 = vpop.f32.mrb[4].mxu1  ;;  %v1670_v38 = vpop.f32.mrb[5].mxu0  ;;  %1727 = vmatpush3.bf16.msra.mxu1 %v648_v33  ;;  %1702 = vmatprep.mubr.msk.bf16.mxu1 %vm1905_vm0, %v1904_v0 }
  0xf9   :  { %v447_v39 = vadd.f32 %v446_v37, %v393_v36  ;;  %v1678_v40 = vpop.f32.mrb[5].mxu1  ;;  %v396_v41 = vpop.f32.mrb[6].mxu0  ;;  %1754 = vmatprep.subr.bf16.mxu1 %v1904_v0 }
  0xfa   :  { %v449_v43 = vpop.f32.mrb[6].mxu1  ;;  %v1671_v44 = vpop.f32.mrb[7].mxu0 }
  0xfb   :  { %v450_v45 = vadd.f32 %v449_v43, %v396_v41  ;;  %v1679_v46 = vpop.f32.mrb[7].mxu1  ;;  %v460_v48 = vadd.f32 %v1509_v42, %v447_v39 }
  0xfd   :  { %v461_v49 = vadd.f32 %v1509_v42, %v450_v45 }
  0xff   :  { %v811_v50 = vpack.c.bf16 %v461_v49, %v460_v48  ;;  %1703 = vmatmul.mubr.msk.bf16.gmra.mrb[12].mxu1 %vm570_vm2, %v2183_v47  ;;  %v535_v51 = vpop.f32.mrb[8].mxu0 }
 0x100   :  { %1706 = vmatprep.mubr.msk.bf16.mxu1 %vm1905_vm0, %v1904_v0  ;;  %v1686_v52 = vpop.f32.mrb[9].mxu0 }
 0x101   :  { %1741 = vmatpush3.bf16.msra.mxu0 %v811_v50  ;;  %v538_v53 = vpop.f32.mrb[10].mxu0 }
 0x102   :  { %v1687_v54 = vpop.f32.mrb[11].mxu0  ;;  %1770 = vmatprep.subr.bf16.mxu0 %v1904_v0 }
 0x104   :  { %1743 = vmatmul.mubr.msk.bf16.vlgmr.msra.gmra.mrb[32].mxu0 %vm570_vm2, %v2151_v22 }
 0x105   :  { %1746 = vmatprep.mubr.msk.bf16.mxu0 %vm1905_vm0, %v1904_v0 }
 0x107   :  { %1707 = vmatmul.mubr.msk.bf16.gmra.mrb[16].mxu1 %vm570_vm2, %v2193_v55  ;;  %v543_v56 = vpop.f32.mrb[12].mxu0 }
 0x108   :  { %1728 = vmatprep.mubr.msk.bf16.mxu1 %vm1905_vm0, %v1904_v0  ;;  %v1690_v57 = vpop.f32.mrb[13].mxu0 }
 0x109   :  { %v546_v58 = vpop.f32.mrb[14].mxu0 }
 0x10a   :  { %v1691_v59 = vpop.f32.mrb[15].mxu0 }
 0x10c   :  { %1747 = vmatmul.mubr.msk.bf16.gmra.mrb[36].mxu0 %vm570_vm2, %v2157_v23 }
 0x10d   :  { %1750 = vmatprep.mubr.msk.bf16.mxu0 %vm1905_vm0, %v1904_v0 }
 0x10f   :  { %1729 = vmatmul.mubr.msk.bf16.vlgmr.msra.gmra.mrb[20].mxu1 %vm570_vm2, %v2151_v22  ;;  %v551_v60 = vpop.f32.mrb[16].mxu0 }
 0x110   :  { %1732 = vmatprep.mubr.msk.bf16.mxu1 %vm1905_vm0, %v1904_v0  ;;  %v1694_v61 = vpop.f32.mrb[17].mxu0  ;;  %1755 = vmatpush3.bf16.msra.mxu1 %v1874_v13 }
 0x111   :  { %v554_v62 = vpop.f32.mrb[18].mxu0  ;;  %1756 = vmatprep.subr.bf16.mxu1 %v1904_v0 }
 0x112   :  { %v1695_v63 = vpop.f32.mrb[19].mxu0 }
 0x114   :  { %1751 = vmatmul.mubr.msk.bf16.gmra.mrb[40].mxu0 %vm570_vm2, %v2163_v24  ;;  %1757 = vmatpush3.bf16.msra.mxu1 %v1875_v14 }
 0x115   :  { %1776 = vmatprep.mubr.msk.bf16.mxu0 %vm1905_vm0, %v1904_v0  ;;  %1780 = vmatprep.subr.bf16.mxu1 %v1904_v0 }
 0x117   :  { %1733 = vmatmul.mubr.msk.bf16.gmra.mrb[24].mxu1 %vm570_vm2, %v2157_v23  ;;  %v2217_v1 = vpop.f32.mrb[20].mxu0 }
 0x118   :  { %1736 = vmatprep.mubr.msk.bf16.mxu1 %vm1905_vm0, %v1904_v0  ;;  %v1716_v2 = vpop.f32.mrb[21].mxu0 }
 0x119   :  { %v2221_v3 = vpop.f32.mrb[22].mxu0 }
 0x11a   :  { %v1717_v4 = vpop.f32.mrb[23].mxu0 }
 0x11f   :  { %1737 = vmatmul.mubr.msk.bf16.gmra.mrb[28].mxu1 %vm570_vm2, %v2163_v24  ;;  %v2225_v5 = vpop.f32.mrb[24].mxu0 }
 0x120   :  { %v1720_v6 = vpop.f32.mrb[25].mxu0  ;;  %1758 = vmatprep.mubr.msk.bf16.mxu1 %vm1905_vm0, %v1904_v0 }
 0x121   :  { %v2229_v7 = vpop.f32.mrb[26].mxu0 }
 0x122   :  { %v1721_v8 = vpop.f32.mrb[27].mxu0 }
 0x127   :  { %v2231_v9 = vpop.f32.mrb[28].mxu0 }
 0x128   :  { %v1724_v10 = vpop.f32.mrb[29].mxu0 }
 0x129   :  { %v718_v11 = vpop.f32.mrb[30].mxu0 }
 0x12a   :  { %v1725_v12 = vpop.f32.mrb[31].mxu0 }
 0x1ca   :  { %v614_v15 = vpop.f32.mrb[8].mxu1 }
 0x1cb   :  { %v615_v16 = vadd.f32 %v614_v15, %v535_v51  ;;  %v1700_v17 = vpop.f32.mrb[9].mxu1 }
 0x1cc   :  { %v617_v18 = vpop.f32.mrb[10].mxu1 }
 0x1cd   :  { %v618_v19 = vadd.f32 %v617_v18, %v538_v53  ;;  %v1701_v20 = vpop.f32.mrb[11].mxu1  ;;  %v643_v32 = vadd.f32 %v1524_v28, %v615_v16 }
 0x1cf   :  { %v644_v37 = vadd.f32 %v1524_v28, %v618_v19 }
 0x1d2   :  { %v622_v21 = vpop.f32.mrb[12].mxu1 }
 0x1d3   :  { %v623_v25 = vadd.f32 %v622_v21, %v543_v56  ;;  %v1704_v26 = vpop.f32.mrb[13].mxu1 }
 0x1d4   :  { %v625_v27 = vpop.f32.mrb[14].mxu1 }
 0x1d5   :  { %v626_v29 = vadd.f32 %v625_v27, %v546_v58  ;;  %v1705_v30 = vpop.f32.mrb[15].mxu1  ;;  %v645_v50 = vadd.f32 %v1524_v28, %v623_v25 }
 0x1d7   :  { %v846_v31 = vpop.f32.mrb[32].mxu0  ;;  %v646_v54 = vadd.f32 %v1524_v28, %v626_v29 }
 0x1d8   :  { %v868_v33 = vmul.f32 0.35355338, %v846_v31  ;;  %v1744_v34 = vpop.f32.mrb[33].mxu0 }
 0x1d9   :  { %v849_v36 = vpop.f32.mrb[34].mxu0 }
 0x1da   :  { %v873_v38 = vmul.f32 %v868_v33, %v643_v32  ;;  %v869_v39 = vmul.f32 0.35355338, %v849_v36  ;;  %v1745_v40 = vpop.f32.mrb[35].mxu0  ;;  %v630_v41 = vpop.f32.mrb[16].mxu1 }
 0x1db   :  { %v631_v42 = vadd.f32 %v630_v41, %v551_v60  ;;  %v1708_v43 = vpop.f32.mrb[17].mxu1 }
 0x1dc   :  { %v874_v44 = vmul.f32 %v869_v39, %v644_v37  ;;  %v633_v45 = vpop.f32.mrb[18].mxu1 }
 0x1dd   :  { %v1709_v46 = vpop.f32.mrb[19].mxu1  ;;  %v647_v10 = vadd.f32 %v1524_v28, %v631_v42 }
 0x1de   :  { %v878_v48 = vpack.c.bf16 %v874_v44, %v873_v38 }
 0x1df   :  { %v854_v49 = vpop.f32.mrb[36].mxu0 }
 0x1e0   :  { %v870_v51 = vmul.f32 0.35355338, %v854_v49  ;;  %v1748_v52 = vpop.f32.mrb[37].mxu0  ;;  %1759 = vmatmul.mubr.msk.bf16.vlgmr.msra.gmra.mrb[32].mxu1 %vm119_vm1, %v878_v48 }
 0x1e1   :  { %v857_v53 = vpop.f32.mrb[38].mxu0  ;;  %1762 = vmatprep.mubr.msk.bf16.mxu1 %vm1905_vm0, %v1904_v0 }
 0x1e2   :  { %v875_v56 = vmul.f32 %v870_v51, %v645_v50  ;;  %v871_v57 = vmul.f32 0.35355338, %v857_v53  ;;  %v1749_v58 = vpop.f32.mrb[39].mxu0  ;;  %v777_v59 = vpop.f32.mrb[20].mxu1 }
 0x1e3   :  { %v2248_v60 = vadd.f32 %v777_v59, %v2217_v1  ;;  %v1730_v61 = vpop.f32.mrb[21].mxu1 }
 0x1e4   :  { %v876_v62 = vmul.f32 %v871_v57, %v646_v54  ;;  %v780_v63 = vpop.f32.mrb[22].mxu1 }
 0x1e5   :  { %v2251_v2 = vadd.f32 %v780_v63, %v2221_v3  ;;  %v1731_v4 = vpop.f32.mrb[23].mxu1 }
 0x1e6   :  { %v879_v6 = vpack.c.bf16 %v876_v62, %v875_v56 }
 0x1e7   :  { %v862_v8 = vpop.f32.mrb[40].mxu0 }
 0x1e8   :  { %v872_v11 = vmul.f32 0.35355338, %v862_v8  ;;  %v1752_v12 = vpop.f32.mrb[41].mxu0  ;;  %1763 = vmatmul.mubr.msk.bf16.gmra.mrb[36].mxu1 %vm119_vm1, %v879_v6 }
 0x1e9   :  { %v865_v13 = vpop.f32.mrb[42].mxu0  ;;  %1766 = vmatprep.mubr.msk.bf16.mxu1 %vm1905_vm0, %v1904_v0 }
 0x1ea   :  { %v877_v1 = vmul.f32 %v872_v11, %v647_v10  ;;  %v1753_v14 = vpop.f32.mrb[43].mxu0  ;;  %v785_v15 = vpop.f32.mrb[24].mxu1 }
 0x1eb   :  { %v2257_v16 = vadd.f32 %v785_v15, %v2225_v5  ;;  %v1734_v3 = vpop.f32.mrb[25].mxu1 }
 0x1ec   :  { %v788_v17 = vpop.f32.mrb[26].mxu1  ;;  %v880_v20 = vpack.c.bf16 %v877_v1, %v877_v1 }
 0x1ed   :  { %v2260_v18 = vadd.f32 %v788_v17, %v2229_v7  ;;  %v1735_v19 = vpop.f32.mrb[27].mxu1 }
 0x1ee   :  { %v1008_v19 = vpop.trf.xlu0 }
 0x1f0   :  { %1767 = vmatmul.mubr.msk.bf16.gmra.mrb[40].mxu1 %vm119_vm1, %v880_v20  ;;  %v1906_v20 = vmov 0  }
 0x1f1   :  { %1782 = vmatprep.mubr.msk.bf16.mxu1 %vm1905_vm0, %v1904_v0  ;;  %1845 = vset.pattern.permute.xlu1 %v1906_v20 }
 0x1f2   :  { %v793_v21 = vpop.f32.mrb[28].mxu1  ;;  %1846 = vset.pattern.permute.xlu0 %v1906_v20 }
 0x1f3   :  { %v2266_v25 = vadd.f32 %v793_v21, %v2231_v9  ;;  %v1738_v26 = vpop.f32.mrb[29].mxu1  ;;  %v1137_v21 = vld [vmem:[%s2404_s5] sm:$0xff] }
 0x1f4   :  { %v796_v27 = vpop.f32.mrb[30].mxu1  ;;  %1144 = vperm.xlu1 %1845, %v1137_v21   ;;  %v1140_v26 = vld [vmem:[%s2404_s5 + $0x18] sm:$0xff] }
 0x1f5   :  { %v1739_v5 = vpop.f32.mrb[31].mxu1  ;;  %v1138_v27 = vld [vmem:[%s2404_s5 + $0x8] sm:$0xff]  ;;  %1159 = vperm.xlu0 %1846, %v1140_v26  }
 0x1f6   :  { %v1139_v5 = vld [vmem:[%s2404_s5 + $0x10] sm:$0xff] }
 0x1f8   :  { %1149 = vperm.xlu1 %1845, %v1138_v27  }
 0x1fc   :  { %1154 = vperm.xlu1 %1845, %v1139_v5  }
 0x2b3   :  { %v940_v28 = vpop.f32.mrb[32].mxu1 }
 0x2b4   :  { %v1760_v29 = vpop.f32.mrb[33].mxu1  ;;  %v963_v39 = vsel %vm962_vm3, %v940_v28, -inf }
 0x2b5   :  { %v943_v30 = vpop.f32.mrb[34].mxu1 }
 0x2b6   :  { %v1761_v31 = vpop.f32.mrb[35].mxu1  ;;  %v964_v44 = vsel %vm962_vm3, %v943_v30, -inf }
 0x2bb   :  { %v948_v7 = vpop.f32.mrb[36].mxu1 }
 0x2bc   :  { %v1764_v32 = vpop.f32.mrb[37].mxu1  ;;  %v965_v34 = vsel %vm962_vm3, %v948_v7, -inf }
 0x2bd   :  { %v951_v33 = vpop.f32.mrb[38].mxu1 }
 0x2be   :  { %v966_v36 = vsel %vm962_vm3, %v951_v33, -inf  ;;  %v1765_v37 = vpop.f32.mrb[39].mxu1 }
 0x2bf   :  { %v971_v38 = vmax.f32 %v965_v34, %v966_v36 }
 0x2c3   :  { %v956_v9 = vpop.f32.mrb[40].mxu1 }
 0x2c4   :  { %v968_v40 = vsel %vm967_vm4, %v956_v9, -inf  ;;  %v1768_v41 = vpop.f32.mrb[41].mxu1 }
 0x2c5   :  { %v969_v42 = vmax.f32 %v963_v39, %v968_v40  ;;  %v959_v43 = vpop.f32.mrb[42].mxu1  ;;  %v1145_v40 = vpop.permute.xlu1 %1144 }
 0x2c6   :  { %v1769_v45 = vpop.f32.mrb[43].mxu1 }
 0x2c7   :  { %v970_v46 = vmax.f32 %v969_v42, %v964_v44 }
 0x2c9   :  { %v972_v48 = vmax.f32 %v970_v46, %v971_v38 }
 0x2cb   :  { %v973_v49 = vrot.slane %v972_v48, 4 }
 0x2cd   :  { %v974_v50 = vmax.f32 %v972_v48, %v973_v49  ;;  %v1150_v49 = vpop.permute.xlu1 %1149 }
 0x2cf   :  { %v975_v51 = vrot.slane %v974_v50, 2 }
 0x2d1   :  { %v976_v52 = vmax.f32 %v974_v50, %v975_v51 }
 0x2d3   :  { %v977_v53 = vrot.slane %v976_v52, 1 }
 0x2d5   :  { %v978_v54 = vmax.f32 %v976_v52, %v977_v53 }
 0x2d7   :  { %v983_v56 = vsub.f32 %v956_v9, %v978_v54  ;;  %v979_v57 = vsub.f32 %v940_v28, %v978_v54  ;;  %v980_v58 = vsub.f32 %v943_v30, %v978_v54  ;;  %v981_v59 = vsub.f32 %v948_v7, %v978_v54  ;;  %v1141_v28 = vld [vmem:[%s2404_s5 + $0x20] sm:$0xf] }
 0x2d8   :  { %v982_v61 = vsub.f32 %v951_v33, %v978_v54  ;;  %1164 = vperm.xlu1 %1845, %v1141_v28  }
 0x2d9   :  { %v984_v62 = vmul.f32 1.442695, %v979_v57  ;;  %v986_v63 = vmul.f32 1.442695, %v980_v58  ;;  %v988_v4 = vmul.f32 1.442695, %v981_v59 }
 0x2da   :  { %v990_v6 = vmul.f32 1.442695, %v982_v61  ;;  %v992_v8 = vmul.f32 1.442695, %v983_v56  ;;  %v1160_v61 = vpop.permute.xlu0 %1159 }
 0x2db   :  { %1880 = vpow2.f32 %v984_v62 }
 0x2dc   :  { %1882 = vpow2.f32 %v986_v63  ;;  %v1155_v63 = vpop.permute.xlu1 %1154 }
 0x2dd   :  { %1884 = vpow2.f32 %v988_v4 }
 0x2de   :  { %1886 = vpow2.f32 %v990_v6 }
 0x2df   :  { %1888 = vpow2.f32 %v992_v8 }
 0x2e5   :  { %v2272_v10 = vpop.eup %1880 }
 0x2e6   :  { %v2274_v11 = vpop.eup %1882 }
 0x2e7   :  { %v2276_v12 = vpop.eup %1884  ;;  %v994_v13 = vpack.c.bf16 %v2274_v11, %v2272_v10 }
 0x2e8   :  { %v2280_v1 = vpop.eup %1886 }
 0x2e9   :  { %v2282_v14 = vpop.eup %1888  ;;  %1771 = vmatpush3.bf16.msra.mxu0 %v994_v13  ;;  %v995_v15 = vpack.c.bf16 %v2280_v1, %v2276_v12 }
 0x2ea   :  { %1772 = vmatprep.subr.bf16.mxu0 %v1904_v0  ;;  %v996_v3 = vpack.c.bf16 %v2282_v14, %v2282_v14 }
 0x2ec   :  { %v1022_v17 = vsel %vm1020_vm5, %v996_v3, 0 }
 0x2ed   :  { %1773 = vmatpush3.bf16.msra.mxu0 %v995_v15 }
 0x2ee   :  { %1774 = vmatprep.subr.bf16.mxu0 %v1904_v0 }
 0x2f1   :  { %1775 = vmatpush3.bf16.msra.mxu0 %v1022_v17 }
 0x2f2   :  { %1794 = vmatprep.subr.bf16.mxu0 %v1904_v0 }
 0x2f4   :  { %1777 = vmatmul.mubr.msk.bf16.vlgmr.msra.gmra.mrb[44].mxu0 %vm1016_vm6, %v1008_v19 }
 0x2f5   :  { %1796 = vmatprep.mubr.msk.bf16.mxu0 %vm1905_vm0, %v1904_v0 }
 0x2fb   :  { %1255 = vxpose.xlu1.c.b16.start [1/3] (short) (narrow) %v2169_v35, 16  ;;  %v1175_v35 = vld [vmem:[%s2405_s18] sm:$0x3] }
 0x2ff   :  { %1256 = vxpose.xlu1.c.b16.cont [2/3] (short) (narrow) %v2183_v47, 16 }
 0x303   :  { %1257 = vxpose.xlu1.c.b16.end [3/3] (short) (narrow) %v2193_v55, 16 }
 0x357   :  { %v1165_v13 = vpop.permute.xlu1 %1164 }
 0x3c7   :  { %v1058_v29 = vpop.f32.mrb[44].mxu0 }
 0x3c8   :  { %v1778_v30 = vpop.f32.mrb[45].mxu0 }
 0x3c9   :  { %v1061_v31 = vpop.f32.mrb[46].mxu0 }
 0x3ca   :  { %v1065_v7 = vpack.c.bf16 %v1061_v31, %v1058_v29  ;;  %v1779_v32 = vpop.f32.mrb[47].mxu0 }
 0x3cc   :  { %1781 = vmatpush3.bf16.msra.mxu1 %v1065_v7 }
 0x3cd   :  { %1808 = vmatprep.subr.bf16.mxu1 %v1904_v0 }
 0x3cf   :  { %1783 = vmatmul.mubr.msk.bf16.vlgmr.msra.gmra.mrb[44].mxu1 %vm570_vm2, %v2151_v22  ;;  %v1186_v22 = vsel %vm1020_vm5, %v1175_v35, 0 }
 0x3d0   :  { %1786 = vmatprep.mubr.msk.bf16.mxu1 %vm1905_vm0, %v1904_v0  ;;  %1795 = vmatpush3.bf16.msra.mxu0 %v1186_v22 }
 0x3d1   :  { %1818 = vmatprep.subr.bf16.mxu0 %v1904_v0 }
 0x3d7   :  { %1787 = vmatmul.mubr.msk.bf16.gmra.mrb[48].mxu1 %vm570_vm2, %v2157_v23 }
 0x3d8   :  { %1790 = vmatprep.mubr.msk.bf16.mxu1 %vm1905_vm0, %v1904_v0 }
 0x3df   :  { %1791 = vmatmul.mubr.msk.bf16.gmra.mrb[52].mxu1 %vm570_vm2, %v2163_v24 }
 0x3e0   :  { %1814 = vmatprep.mubr.msk.bf16.mxu1 %vm1905_vm0, %v1904_v0 }
 0x4a2   :  { %v1100_v47 = vpop.f32.mrb[44].mxu1 }
 0x4a3   :  { %v1122_v23 = vmax.f32 %v1100_v47, 1e-12  ;;  %v1784_v55 = vpop.f32.mrb[45].mxu1 }
 0x4a4   :  { %v1103_v33 = vpop.f32.mrb[46].mxu1 }
 0x4a5   :  { %1890 = vrcp.f32 %v1122_v23  ;;  %v1123_v34 = vmax.f32 %v1103_v33, 1e-12  ;;  %v1785_v36 = vpop.f32.mrb[47].mxu1 }
 0x4a7   :  { %1892 = vrcp.f32 %v1123_v34 }
 0x4aa   :  { %v1108_v24 = vpop.f32.mrb[48].mxu1 }
 0x4ab   :  { %v1124_v37 = vmax.f32 %v1108_v24, 1e-12  ;;  %v1788_v38 = vpop.f32.mrb[49].mxu1 }
 0x4ac   :  { %v1111_v9 = vpop.f32.mrb[50].mxu1 }
 0x4ad   :  { %1894 = vrcp.f32 %v1124_v37  ;;  %v1125_v39 = vmax.f32 %v1111_v9, 1e-12  ;;  %v1789_v41 = vpop.f32.mrb[51].mxu1  ;;  %v1263_v37 = vpop.trf.xlu1 }
 0x4ae   :  { %v1878_v41 = vld [vmem:[%s2408_s21] sm:$0xff]  }
 0x4af   :  { %v1891_v42 = vpop.eup %1890  ;;  %1896 = vrcp.f32 %v1125_v39 }
 0x4b0   :  { %v1128_v43 = vmul.f32 %v1891_v42, %v2272_v10  ;;  %v1879_v42 = vld [vmem:[%s2408_s21 + $0x8] sm:$0xff]  }
 0x4b1   :  { %v1893_v44 = vpop.eup %1892 }
 0x4b2   :  { %v1116_v45 = vpop.f32.mrb[52].mxu1  ;;  %v1130_v46 = vmul.f32 %v1893_v44, %v2274_v11  ;;  %v1167_v51 = vmul.f32 %v1145_v40, %v1128_v43  ;;  %v1553_v43 = vld [vmem:[%s2409_s20] ss:$0 sm:$0xff] }
 0x4b3   :  { %v1126_v48 = vmax.f32 %v1116_v45, 1e-12  ;;  %v1792_v50 = vpop.f32.mrb[53].mxu1 }
 0x4b4   :  { %v1168_v52 = vmul.f32 %v1150_v49, %v1130_v46  ;;  %v1119_v53 = vpop.f32.mrb[54].mxu1 }
 0x4b5   :  { %1898 = vrcp.f32 %v1126_v48  ;;  %v1793_v54 = vpop.f32.mrb[55].mxu1 }
 0x4b6   :  { %v1172_v56 = vpack.c.bf16 %v1168_v52, %v1167_v51 }
 0x4b7   :  { %v1895_v57 = vpop.eup %1894 }
 0x4b8   :  { %1797 = vmatmul.mubr.msk.bf16.vlgmr.msra.gmra.mrb[48].mxu0 %vm962_vm3, %v1172_v56  ;;  %v1132_v58 = vmul.f32 %v1895_v57, %v2276_v12 }
 0x4b9   :  { %v1897_v59 = vpop.eup %1896  ;;  %1800 = vmatprep.mubr.msk.bf16.mxu0 %vm1905_vm0, %v1904_v0 }
 0x4ba   :  { %v1134_v62 = vmul.f32 %v1897_v59, %v2280_v1  ;;  %v1169_v4 = vmul.f32 %v1155_v63, %v1132_v58  ;;  %v1876_v1 = vld [vmem:[%s2406_s19] sm:$0xff]  }
 0x4bb   :  { %1819 = vmatpush3.bf16.msra.mxu0 %v1876_v1 }
 0x4bc   :  { %v1170_v6 = vmul.f32 %v1160_v61, %v1134_v62  ;;  %1820 = vmatprep.subr.bf16.mxu0 %v1904_v0 }
 0x4be   :  { %v1173_v8 = vpack.c.bf16 %v1170_v6, %v1169_v4 }
 0x4bf   :  { %v1899_v10 = vpop.eup %1898 }
 0x4c0   :  { %v1136_v11 = vmul.f32 %v1899_v10, %v2282_v14  ;;  %1801 = vmatmul.mubr.msk.bf16.gmra.mrb[52].mxu0 %vm962_vm3, %v1173_v8  ;;  %v1536_v14 = vld [vmem:[%s2407_s13] ss:$0 sm:$0xff] }
 0x4c1   :  { %1804 = vmatprep.mubr.msk.bf16.mxu0 %vm1905_vm0, %v1904_v0  ;;  %v806_v3 = vadd.f32 %v1536_v14, %v2248_v60  ;;  %v807_v21 = vadd.f32 %v1536_v14, %v2251_v2  ;;  %v808_v29 = vadd.f32 %v1536_v14, %v2257_v16  ;;  %v809_v32 = vadd.f32 %v1536_v14, %v2260_v18  ;;  %v1877_v18 = vld [vmem:[%s2406_s19 + $0x8] sm:$0xff]  }
 0x4c2   :  { %v1171_v12 = vmul.f32 %v1165_v13, %v1136_v11  ;;  %v810_v2 = vadd.f32 %v1536_v14, %v2266_v25  ;;  %1821 = vmatpush3.bf16.msra.mxu0 %v1877_v18 }
 0x4c4   :  { %v1174_v15 = vpack.c.bf16 %v1171_v12, %v1171_v12 }
 0x4c8   :  { %1805 = vmatmul.mubr.msk.bf16.gmra.mrb[56].mxu0 %vm962_vm3, %v1174_v15 }
 0x4c9   :  { %1822 = vmatprep.mubr.msk.bf16.mxu0 %vm1905_vm0, %v1904_v0 }
 0x58b   :  { %v1222_v17 = vpop.f32.mrb[48].mxu0 }
 0x58c   :  { %v1244_v19 = vmul.f32 %v1222_v17, %v806_v3  ;;  %v1798_v20 = vpop.f32.mrb[49].mxu0 }
 0x58d   :  { %v1225_v26 = vpop.f32.mrb[50].mxu0 }
 0x58e   :  { %v1245_v27 = vmul.f32 %v1225_v26, %v807_v21  ;;  %v1799_v5 = vpop.f32.mrb[51].mxu0 }
 0x590   :  { %v1249_v28 = vpack.c.bf16 %v1245_v27, %v1244_v19 }
 0x592   :  { %1809 = vmatpush3.bf16.msra.mxu1 %v1249_v28 }
 0x593   :  { %v1230_v30 = vpop.f32.mrb[52].mxu0  ;;  %1810 = vmatprep.subr.bf16.mxu1 %v1904_v0 }
 0x594   :  { %v1246_v31 = vmul.f32 %v1230_v30, %v808_v29  ;;  %v1802_v7 = vpop.f32.mrb[53].mxu0 }
 0x595   :  { %v1233_v60 = vpop.f32.mrb[54].mxu0 }
 0x596   :  { %v1247_v35 = vmul.f32 %v1233_v60, %v809_v32  ;;  %v1803_v22 = vpop.f32.mrb[55].mxu0 }
 0x598   :  { %v1250_v47 = vpack.c.bf16 %v1247_v35, %v1246_v31 }
 0x59a   :  { %1811 = vmatpush3.bf16.msra.mxu1 %v1250_v47 }
 0x59b   :  { %v1238_v23 = vpop.f32.mrb[56].mxu0  ;;  %1812 = vmatprep.subr.bf16.mxu1 %v1904_v0 }
 0x59c   :  { %v1248_v55 = vmul.f32 %v1238_v23, %v810_v2  ;;  %v1806_v33 = vpop.f32.mrb[57].mxu0 }
 0x59d   :  { %v1241_v16 = vpop.f32.mrb[58].mxu0 }
 0x59e   :  { %v1251_v34 = vpack.c.bf16 %v1248_v55, %v1248_v55  ;;  %v1807_v36 = vpop.f32.mrb[59].mxu0 }
 0x5a0   :  { %v1275_v24 = vsel %vm1020_vm5, %v1251_v34, 0 }
 0x5a1   :  { %1813 = vmatpush3.bf16.msra.mxu1 %v1275_v24 }
 0x5a2   :  { %1826 = vmatprep.subr.bf16.mxu1 %v1904_v0 }
 0x5a4   :  { %1815 = vmatmul.mubr.msk.bf16.vlgmr.msra.gmra.mrb[56].mxu1 %vm1016_vm6, %v1263_v37 }
 0x5a5   :  { %1830 = vmatprep.mubr.msk.bf16.mxu1 %vm1905_vm0, %v1904_v0  ;;  %1827 = vmatpush3.bf16.msra.mxu1 %v1878_v41 }
 0x5a6   :  { %1828 = vmatprep.subr.bf16.mxu1 %v1904_v0  ;;  %v1557_v0 = vld [vmem:[%s2410_s22] ss:$0 sm:$0xff] }
 0x5a9   :  { %1829 = vmatpush3.bf16.msra.mxu1 %v1879_v42 }
 0x677   :  { %v1311_v25 = vpop.f32.mrb[56].mxu1 }
 0x678   :  { %v1816_v38 = vpop.f32.mrb[57].mxu1 }
 0x679   :  { %v1314_v9 = vpop.f32.mrb[58].mxu1 }
 0x67a   :  { %v1318_v39 = vpack.c.bf16 %v1314_v9, %v1311_v25  ;;  %v1817_v40 = vpop.f32.mrb[59].mxu1 }
 0x67c   :  { %1823 = vmatmul.mubr.msk.bf16.vlgmr.msra.gmra.mrb[60].mxu0 %vm119_vm1, %v1318_v39 }
 0x74f   :  { %v1379_v44 = vpop.f32.mrb[60].mxu0 }
 0x750   :  { %v1380_v45 = vadd.f32 %v1553_v43, %v1379_v44  ;;  %v1824_v46 = vpop.f32.mrb[61].mxu0 }
 0x751   :  { %v1382_v48 = vpop.f32.mrb[62].mxu0 }
 0x752   :  { %v1383_v49 = vadd.f32 %v1553_v43, %v1382_v48  ;;  %v1825_v50 = vpop.f32.mrb[63].mxu0  ;;  %v1386_v51 = vmax.f32 %v1380_v45, 0.0 }
 0x754   :  { %v1387_v52 = vmax.f32 %v1383_v49, 0.0 }
 0x756   :  { %v1388_v53 = vpack.c.bf16 %v1387_v52, %v1386_v51 }
 0x758   :  { %1831 = vmatmul.mubr.msk.bf16.vlgmr.msra.gmra.mrb[60].mxu1 %vm119_vm1, %v1388_v53 }
 0x82b   :  { %v1449_v54 = vpop.f32.mrb[60].mxu1 }
 0x82c   :  { %v1450_v56 = vadd.f32 %v1557_v0, %v1449_v54  ;;  %v1832_v57 = vpop.f32.mrb[61].mxu1 }
 0x82d   :  { %v1452_v58 = vpop.f32.mrb[62].mxu1 }
 0x82e   :  { %v1458_v59 = vmul.f32 0.044715, %v1450_v56  ;;  %v1453_v61 = vadd.f32 %v1557_v0, %v1452_v58  ;;  %v1833_v62 = vpop.f32.mrb[63].mxu1  ;;  %v1456_v14 = vmul.f32 0.5, %v1450_v56 }
 0x830   :  { %v1460_v63 = vmul.f32 %v1458_v59, %v1450_v56  ;;  %v1459_v4 = vmul.f32 0.044715, %v1453_v61  ;;  %v1457_v20 = vmul.f32 0.5, %v1453_v61 }
 0x832   :  { %v1462_v6 = vmul.f32 %v1460_v63, %v1450_v56  ;;  %v1461_v8 = vmul.f32 %v1459_v4, %v1453_v61 }
 0x834   :  { %v1464_v10 = vadd.f32 %v1462_v6, %v1450_v56  ;;  %v1463_v11 = vmul.f32 %v1461_v8, %v1453_v61 }
 0x836   :  { %v1466_v13 = vmul.f32 0.7978846, %v1464_v10  ;;  %v1465_v12 = vadd.f32 %v1463_v11, %v1453_v61 }
 0x838   :  { %1900 = vtanh.f32 %v1466_v13  ;;  %v1467_v15 = vmul.f32 0.7978846, %v1465_v12 }
 0x83a   :  { %1902 = vtanh.f32 %v1467_v15 }
 0x842   :  { %v1901_v1 = vpop.eup %1900 }
 0x843   :  { %v1470_v3 = vadd.f32 1.0, %v1901_v1 }
 0x844   :  { %v1903_v17 = vpop.eup %1902 }
 0x845   :  { %v1472_v19 = vmul.f32 %v1470_v3, %v1456_v14  ;;  %v1471_v21 = vadd.f32 1.0, %v1903_v17 }
 0x847   :  { %v1563_v26 = vpack.c.bf16 %v1472_v19, %v1472_v19  ;;  %v1473_v27 = vmul.f32 %v1471_v21, %v1457_v20 }
 0x849   :  { %1483 = vst.msk [vmem:[%s2411_s23] sm:$0xf] %vm1482_vm7, %v1563_v26  ;;  %v1564_v5 = vpack.c.bf16 %v1473_v27, %v1473_v27 }
 0x84b   :  { %1484 = vst.msk [vmem:[%s2411_s23 + $0x4] sm:$0xf] %vm1482_vm7, %v1564_v5 }

</bundles_post_ra>
